<compile_context>
chip_gen: v6e
topology: v6e:2x2x1
jax: 0.10.0
libtpu: 0.0.40
codegen_flags: <defaults>
</compile_context>

<pallas_src>
import math

import jax
import jax.numpy as jnp
from jax import lax
from jax.experimental import pallas as pl
from jax.experimental.pallas import tpu as pltpu

_LN_EPS = 1e-5
_MASK_VALUE = -1e6  # matches reference sequence_mask(value=-1000000.0)


def _layer_norm_f32(x, gamma, beta):
    mu = jnp.mean(x, axis=-1, keepdims=True)
    xc = x - mu
    var = jnp.mean(xc * xc, axis=-1, keepdims=True)
    return xc * lax.rsqrt(var + _LN_EPS) * gamma + beta


def _make_encoder_block_kernel(num_heads, head_dim):
    scale = 1.0 / math.sqrt(head_dim)

    def kernel(vl_ref,                      # scalar prefetch: (B,) int32 in SMEM
               xf_ref,                      # (1, S, H)  full sequence (keys/values)
               xq_ref,                      # (1, TQ, H) query-row tile
               wq_ref, wk_ref, wv_ref,      # (nh, H, hd) per-head projections
               wo_ref,                      # (H, H)
               g1_ref, be1_ref,             # (1, H) layernorm1 gamma / beta
               w1_ref, bb1_ref,             # (H, F), (1, F)
               w2_ref, bb2_ref,             # (F, H), (1, H)
               g2_ref, be2_ref,             # (1, H) layernorm2 gamma / beta
               o_ref,                       # (1, TQ, H)
               concat_ref):                 # (TQ, H) VMEM scratch (head concat)
        b = pl.program_id(0)
        x_kv = xf_ref[0]                    # (S, H)  — keep MXU operands narrow
        x_q = xq_ref[0]                     # (TQ, H)
        cdt = x_q.dtype
        S = x_kv.shape[0]
        TQ = x_q.shape[0]
        hd = head_dim

        # Additive key mask (0 / -1e6), built ONCE for all heads.
        valid_len = vl_ref[b]
        key_ids = lax.broadcasted_iota(jnp.int32, (TQ, S), 1)
        mask_bias = jnp.where(key_ids < valid_len, 0.0,
                              _MASK_VALUE).astype(jnp.float32)

        # Per-head attention; each head's output lands in the concat scratch.
        # Python unroll is fine for small num_heads; use fori_loop / a grid
        # axis for many heads to bound live ranges.
        for h in range(num_heads):
            qh = jnp.dot(x_q, wq_ref[h], preferred_element_type=jnp.float32)
            kh = jnp.dot(x_kv, wk_ref[h], preferred_element_type=jnp.float32)
            vh = jnp.dot(x_kv, wv_ref[h], preferred_element_type=jnp.float32)
            qh = (qh * scale).astype(cdt)   # scale on (TQ,hd), not (TQ,S) scores
            kh = kh.astype(cdt)
            vh = vh.astype(cdt)

            s = lax.dot_general(qh, kh, (((1,), (1,)), ((), ())),
                                preferred_element_type=jnp.float32)
            s = s + mask_bias
            m = jnp.max(s, axis=-1, keepdims=True)
            p = jnp.exp(s - m)
            denom = jnp.sum(p, axis=-1, keepdims=True)
            p = p * pl.reciprocal(denom, approx=True)        # EUP, frees VALU
            oh = jnp.dot(p.astype(cdt), vh, preferred_element_type=jnp.float32)
            concat_ref[:, h * hd:(h + 1) * hd] = oh.astype(cdt)

        # Single output projection: one MXU matmul with full K=H contraction.
        attn = jnp.dot(concat_ref[...], wo_ref[...],
                       preferred_element_type=jnp.float32)

        # AddNorm1 (dropout == identity in eval mode); stats in f32.
        y = _layer_norm_f32(attn + x_q.astype(jnp.float32),
                            g1_ref[...].astype(jnp.float32),
                            be1_ref[...].astype(jnp.float32))

        # PositionWiseFFN.
        h1 = jnp.dot(y.astype(cdt), w1_ref[...],
                     preferred_element_type=jnp.float32)
        h1 = jnp.maximum(h1 + bb1_ref[...].astype(jnp.float32), 0.0)
        f = jnp.dot(h1.astype(cdt), w2_ref[...],
                    preferred_element_type=jnp.float32)
        f = f + bb2_ref[...].astype(jnp.float32)

        # AddNorm2.
        out = _layer_norm_f32(f + y,
                              g2_ref[...].astype(jnp.float32),
                              be2_ref[...].astype(jnp.float32))
        o_ref[0] = out.astype(o_ref.dtype)

    return kernel


def encoder_block_forward(x, valid_lens, params, num_heads, *, block_q=None,
                          vmem_limit_bytes=48 * 1024 * 1024):
    """Pallas forward for EncoderBlock.

    x:          (B, S, H) activations.
    valid_lens: (B,) int32 valid key lengths (or None for no masking).
    params:     W_q/W_k/W_v/W_o (H,H); ln1_g/ln1_b (1,H); ffn_w1 (H,F),
                ffn_b1 (1,F), ffn_w2 (F,H), ffn_b2 (1,H); ln2_g/ln2_b (1,H).
    """
    B, S, H = x.shape
    F = params["ffn_w1"].shape[1]
    hd = H // num_heads
    assert num_heads * hd == H

    if valid_lens is None:
        valid_lens = jnp.full((B,), S, dtype=jnp.int32)
    valid_lens = valid_lens.astype(jnp.int32)

    # Query-row tiling: caps per-step VMEM (v7x = 64 MiB) and provides extra
    # parallel grid steps for megacore when B is 1 or odd.
    if block_q is None:
        block_q = S if S <= 256 else 256
    if block_q >= S or S % block_q != 0 or block_q % 8 != 0:
        block_q = S
    num_q = S // block_q

    # Pre-split QKV weights per head: kernel indexes the leading axis instead
    # of lane-slicing activations at non-128 boundaries.
    def split_heads(w):  # (H, H) -> (num_heads, H, hd)
        return w.reshape(H, num_heads, hd).transpose(1, 0, 2)

    wq_h = split_heads(params["W_q"])
    wk_h = split_heads(params["W_k"])
    wv_h = split_heads(params["W_v"])

    const2 = lambda b, q, vl: (0, 0)
    const3 = lambda b, q, vl: (0, 0, 0)

    in_specs = [
        pl.BlockSpec((1, S, H), lambda b, q, vl: (b, 0, 0)),         # x (K/V rows)
        pl.BlockSpec((1, block_q, H), lambda b, q, vl: (b, q, 0)),   # x (Q rows)
        pl.BlockSpec((num_heads, H, hd), const3),                    # W_q heads
        pl.BlockSpec((num_heads, H, hd), const3),                    # W_k heads
        pl.BlockSpec((num_heads, H, hd), const3),                    # W_v heads
        pl.BlockSpec((H, H), const2),                                # W_o
        pl.BlockSpec((1, H), const2),                                # ln1 gamma
        pl.BlockSpec((1, H), const2),                                # ln1 beta
        pl.BlockSpec((H, F), const2),                                # ffn W1
        pl.BlockSpec((1, F), const2),                                # ffn b1
        pl.BlockSpec((F, H), const2),                                # ffn W2
        pl.BlockSpec((1, H), const2),                                # ffn b2
        pl.BlockSpec((1, H), const2),                                # ln2 gamma
        pl.BlockSpec((1, H), const2),                                # ln2 beta
    ]

    return pl.pallas_call(
        _make_encoder_block_kernel(num_heads, hd),
        out_shape=jax.ShapeDtypeStruct((B, S, H), x.dtype),
        grid_spec=pltpu.PrefetchScalarGridSpec(
            num_scalar_prefetch=1,
            grid=(B, num_q),
            in_specs=in_specs,
            out_specs=pl.BlockSpec((1, block_q, H), lambda b, q, vl: (b, q, 0)),
            scratch_shapes=[pltpu.VMEM((block_q, H), x.dtype)],
        ),
        compiler_params=pltpu.CompilerParams(
            dimension_semantics=("parallel", "parallel"),
            vmem_limit_bytes=vmem_limit_bytes,
        ),
    )(valid_lens, x, x,
      wq_h, wk_h, wv_h, params["W_o"],
      params["ln1_g"], params["ln1_b"],
      params["ffn_w1"], params["ffn_b1"], params["ffn_w2"], params["ffn_b2"],
      params["ln2_g"], params["ln2_b"])


# ----------------------------- pure-JAX reference ---------------------------
def _ln_ref(x, g, b):
    mu = jnp.mean(x, axis=-1, keepdims=True)
    var = jnp.mean((x - mu) ** 2, axis=-1, keepdims=True)
    return (x - mu) / jnp.sqrt(var + _LN_EPS) * g + b


def encoder_block_ref(x, valid_lens, params, num_heads):
    B, S, H = x.shape
    hd = H // num_heads
    q = x @ params["W_q"]
    k = x @ params["W_k"]
    v = x @ params["W_v"]
    split = lambda t: t.reshape(B, S, num_heads, hd).transpose(0, 2, 1, 3)
    qh, kh, vh = split(q), split(k), split(v)
    scores = jnp.einsum("bhqd,bhkd->bhqk", qh, kh) / math.sqrt(hd)
    mask = (jnp.arange(S)[None, :] < valid_lens[:, None])[:, None, None, :]
    scores = jnp.where(mask, scores, _MASK_VALUE)
    w = jax.nn.softmax(scores, axis=-1)
    o = jnp.einsum("bhqk,bhkd->bhqd", w, vh).transpose(0, 2, 1, 3).reshape(B, S, H)
    attn = o @ params["W_o"]
    y = _ln_ref(attn + x, params["ln1_g"], params["ln1_b"])
    f = jnp.maximum(y @ params["ffn_w1"] + params["ffn_b1"], 0.0) @ params["ffn_w2"]
    f = f + params["ffn_b2"]
    return _ln_ref(f + y, params["ln2_g"], params["ln2_b"])


if __name__ == "__main__":
    B, S, H, NH, F = 2, 8, 32, 4, 64
    key = jax.random.PRNGKey(0)
    ks = jax.random.split(key, 8)

    x = jax.random.normal(ks[0], (B, S, H), dtype=jnp.float32)
    valid_lens = jnp.array([6, 8], dtype=jnp.int32)

    params = {
        "W_q": 0.1 * jax.random.normal(ks[1], (H, H), jnp.float32),
        "W_k": 0.1 * jax.random.normal(ks[2], (H, H), jnp.float32),
        "W_v": 0.1 * jax.random.normal(ks[3], (H, H), jnp.float32),
        "W_o": 0.1 * jax.random.normal(ks[4], (H, H), jnp.float32),
        "ln1_g": jnp.ones((1, H), jnp.float32),
        "ln1_b": jnp.zeros((1, H), jnp.float32),
        "ffn_w1": 0.1 * jax.random.normal(ks[5], (H, F), jnp.float32),
        "ffn_b1": 0.01 * jax.random.normal(ks[6], (1, F), jnp.float32),
        "ffn_w2": 0.1 * jax.random.normal(ks[7], (F, H), jnp.float32),
        "ffn_b2": jnp.zeros((1, H), jnp.float32),
        "ln2_g": jnp.ones((1, H), jnp.float32),
        "ln2_b": jnp.zeros((1, H), jnp.float32),
    }

    y = encoder_block_forward(x, valid_lens, params, NH)
    jax.block_until_ready(y)

    y_ref = encoder_block_ref(x, valid_lens, params, NH)
    assert y.shape == x.shape and y.dtype == x.dtype
    # Tolerance accounts for the approximate EUP reciprocal in the softmax.
    assert jnp.allclose(y, y_ref, rtol=5e-3, atol=5e-3), (
        float(jnp.max(jnp.abs(y - y_ref))))

    print("KERNEL_OK")
</pallas_src>

<mosaic_0001>
module attributes {stable_mosaic.version = 11 : i64} {
  func.func @kernel(%arg0: i32, %arg1: i32, %arg2: memref<2xi32, #tpu.memory_space<smem>>, %arg3: memref<1x8x32xf32, #tpu.memory_space<vmem>>, %arg4: memref<1x8x32xf32, #tpu.memory_space<vmem>>, %arg5: memref<4x32x8xf32, #tpu.memory_space<vmem>>, %arg6: memref<4x32x8xf32, #tpu.memory_space<vmem>>, %arg7: memref<4x32x8xf32, #tpu.memory_space<vmem>>, %arg8: memref<32x32xf32, #tpu.memory_space<vmem>>, %arg9: memref<1x32xf32, #tpu.memory_space<vmem>>, %arg10: memref<1x32xf32, #tpu.memory_space<vmem>>, %arg11: memref<32x64xf32, #tpu.memory_space<vmem>>, %arg12: memref<1x64xf32, #tpu.memory_space<vmem>>, %arg13: memref<64x32xf32, #tpu.memory_space<vmem>>, %arg14: memref<1x32xf32, #tpu.memory_space<vmem>>, %arg15: memref<1x32xf32, #tpu.memory_space<vmem>>, %arg16: memref<1x32xf32, #tpu.memory_space<vmem>>, %arg17: memref<1x8x32xf32, #tpu.memory_space<vmem>>, %arg18: memref<8x32xf32, #tpu.memory_space<vmem>>) attributes {dimension_semantics = [#tpu.dimension_semantics<parallel>, #tpu.dimension_semantics<parallel>], iteration_bounds = array<i64: 2, 1>, scalar_prefetch = 1 : i64, scratch_operands = 1 : i64, tpu.core_type = #tpu.core_type<tc>, window_params = [{transform_indices = @transform_0, window_bounds = array<i64: 1, 8, 32>}, {transform_indices = @transform_1, window_bounds = array<i64: 1, 8, 32>}, {pipeline_mode = #tpu.pipeline_mode<synchronous>, transform_indices = @transform_2, window_bounds = array<i64: 4, 32, 8>}, {pipeline_mode = #tpu.pipeline_mode<synchronous>, transform_indices = @transform_3, window_bounds = array<i64: 4, 32, 8>}, {pipeline_mode = #tpu.pipeline_mode<synchronous>, transform_indices = @transform_4, window_bounds = array<i64: 4, 32, 8>}, {pipeline_mode = #tpu.pipeline_mode<synchronous>, transform_indices = @transform_5, window_bounds = array<i64: 32, 32>}, {pipeline_mode = #tpu.pipeline_mode<synchronous>, transform_indices = @transform_6, window_bounds = array<i64: 1, 32>}, {pipeline_mode = #tpu.pipeline_mode<synchronous>, transform_indices = @transform_7, window_bounds = array<i64: 1, 32>}, {pipeline_mode = #tpu.pipeline_mode<synchronous>, transform_indices = @transform_8, window_bounds = array<i64: 32, 64>}, {pipeline_mode = #tpu.pipeline_mode<synchronous>, transform_indices = @transform_9, window_bounds = array<i64: 1, 64>}, {pipeline_mode = #tpu.pipeline_mode<synchronous>, transform_indices = @transform_10, window_bounds = array<i64: 64, 32>}, {pipeline_mode = #tpu.pipeline_mode<synchronous>, transform_indices = @transform_11, window_bounds = array<i64: 1, 32>}, {pipeline_mode = #tpu.pipeline_mode<synchronous>, transform_indices = @transform_12, window_bounds = array<i64: 1, 32>}, {pipeline_mode = #tpu.pipeline_mode<synchronous>, transform_indices = @transform_13, window_bounds = array<i64: 1, 32>}, {transform_indices = @transform_14, window_bounds = array<i64: 1, 8, 32>}]} {
    %c0 = arith.constant 0 : index
    %c0_0 = arith.constant 0 : index
    %c0_1 = arith.constant 0 : index
    %0 = vector.load %arg3[%c0, %c0_0, %c0_1] : memref<1x8x32xf32, #tpu.memory_space<vmem>>, vector<1x8x32xf32>
    %1 = vector.shape_cast %0 : vector<1x8x32xf32> to vector<8x32xf32>
    %c0_2 = arith.constant 0 : index
    %c0_3 = arith.constant 0 : index
    %c0_4 = arith.constant 0 : index
    %2 = vector.load %arg4[%c0_2, %c0_3, %c0_4] : memref<1x8x32xf32, #tpu.memory_space<vmem>>, vector<1x8x32xf32>
    %3 = vector.shape_cast %2 : vector<1x8x32xf32> to vector<8x32xf32>
    %4 = arith.index_cast %arg0 : i32 to index
    %5 = memref.load %arg2[%4] : memref<2xi32, #tpu.memory_space<smem>>
    %6 = tpu.iota {dimensions = array<i32: 1>} : vector<8x8xi32>
    %7 = vector.broadcast %5 : i32 to vector<8x8xi32>
    %8 = arith.cmpi slt, %6, %7 : vector<8x8xi32>
    %cst = arith.constant 0.000000e+00 : f32
    %cst_5 = arith.constant -1.000000e+06 : f32
    %9 = vector.broadcast %cst : f32 to vector<8x8xf32>
    %10 = vector.broadcast %cst_5 : f32 to vector<8x8xf32>
    %11 = arith.select %8, %9, %10 : vector<8x8xi1>, vector<8x8xf32>
    %c0_6 = arith.constant 0 : index
    %c0_7 = arith.constant 0 : index
    %c0_8 = arith.constant 0 : index
    %12 = vector.load %arg5[%c0_6, %c0_7, %c0_8] : memref<4x32x8xf32, #tpu.memory_space<vmem>>, vector<1x32x8xf32>
    %13 = vector.shape_cast %12 : vector<1x32x8xf32> to vector<32x8xf32>
    %cst_9 = arith.constant dense<0.000000e+00> : vector<8x8xf32>
    %14 = tpu.matmul %3, %13, %cst_9 {dimension_numbers = #tpu.dot_dimension_numbers<[1], [0], [0], [1], [0, 0, 1, 1], [], []>} : vector<8x32xf32>, vector<32x8xf32>, vector<8x8xf32> -> vector<8x8xf32>
    %c0_10 = arith.constant 0 : index
    %c0_11 = arith.constant 0 : index
    %c0_12 = arith.constant 0 : index
    %15 = vector.load %arg6[%c0_10, %c0_11, %c0_12] : memref<4x32x8xf32, #tpu.memory_space<vmem>>, vector<1x32x8xf32>
    %16 = vector.shape_cast %15 : vector<1x32x8xf32> to vector<32x8xf32>
    %cst_13 = arith.constant dense<0.000000e+00> : vector<8x8xf32>
    %17 = tpu.matmul %1, %16, %cst_13 {dimension_numbers = #tpu.dot_dimension_numbers<[1], [0], [0], [1], [0, 0, 1, 1], [], []>} : vector<8x32xf32>, vector<32x8xf32>, vector<8x8xf32> -> vector<8x8xf32>
    %c0_14 = arith.constant 0 : index
    %c0_15 = arith.constant 0 : index
    %c0_16 = arith.constant 0 : index
    %18 = vector.load %arg7[%c0_14, %c0_15, %c0_16] : memref<4x32x8xf32, #tpu.memory_space<vmem>>, vector<1x32x8xf32>
    %19 = vector.shape_cast %18 : vector<1x32x8xf32> to vector<32x8xf32>
    %cst_17 = arith.constant dense<0.000000e+00> : vector<8x8xf32>
    %20 = tpu.matmul %1, %19, %cst_17 {dimension_numbers = #tpu.dot_dimension_numbers<[1], [0], [0], [1], [0, 0, 1, 1], [], []>} : vector<8x32xf32>, vector<32x8xf32>, vector<8x8xf32> -> vector<8x8xf32>
    %cst_18 = arith.constant 0.353553385 : f32
    %21 = vector.broadcast %cst_18 : f32 to vector<8x8xf32>
    %22 = arith.mulf %14, %21 : vector<8x8xf32>
    %cst_19 = arith.constant dense<0.000000e+00> : vector<8x8xf32>
    %23 = tpu.matmul %22, %17, %cst_19 {dimension_numbers = #tpu.dot_dimension_numbers<[1], [1], [0], [0], [0, 0, 1, 0], [], []>} : vector<8x8xf32>, vector<8x8xf32>, vector<8x8xf32> -> vector<8x8xf32>
    %24 = arith.addf %23, %11 : vector<8x8xf32>
    %cst_20 = arith.constant dense<0xFF800000> : vector<8xf32>
    %25 = vector.multi_reduction <maximumf>, %24, %cst_20 [1] : vector<8x8xf32> to vector<8xf32>
    %26 = vector.shape_cast %25 : vector<8xf32> to vector<8x1xf32>
    %27 = vector.broadcast %26 : vector<8x1xf32> to vector<8x8xf32>
    %28 = arith.subf %24, %27 : vector<8x8xf32>
    %29 = math.exp %28 : vector<8x8xf32>
    %cst_21 = arith.constant dense<0.000000e+00> : vector<8xf32>
    %30 = vector.multi_reduction <add>, %29, %cst_21 [1] : vector<8x8xf32> to vector<8xf32>
    %31 = vector.shape_cast %30 : vector<8xf32> to vector<8x1xf32>
    %32 = tpu.reciprocal %31 {approx = true} : vector<8x1xf32> -> vector<8x1xf32>
    %33 = vector.broadcast %32 : vector<8x1xf32> to vector<8x8xf32>
    %34 = arith.mulf %29, %33 : vector<8x8xf32>
    %cst_22 = arith.constant dense<0.000000e+00> : vector<8x8xf32>
    %35 = tpu.matmul %34, %20, %cst_22 {dimension_numbers = #tpu.dot_dimension_numbers<[1], [0], [0], [1], [0, 0, 1, 1], [], []>} : vector<8x8xf32>, vector<8x8xf32>, vector<8x8xf32> -> vector<8x8xf32>
    %c0_23 = arith.constant 0 : index
    %c0_24 = arith.constant 0 : index
    %36 = vector.load %arg18[%c0_23, %c0_24] : memref<8x32xf32, #tpu.memory_space<vmem>>, vector<8x8xf32>
    tpu.vector_store %arg18[%c0_23, %c0_24], %35 {strides = array<i32>} : memref<8x32xf32, #tpu.memory_space<vmem>>, vector<8x8xf32>,
    %c1 = arith.constant 1 : index
    %c0_25 = arith.constant 0 : index
    %c0_26 = arith.constant 0 : index
    %37 = vector.load %arg5[%c1, %c0_25, %c0_26] : memref<4x32x8xf32, #tpu.memory_space<vmem>>, vector<1x32x8xf32>
    %38 = vector.shape_cast %37 : vector<1x32x8xf32> to vector<32x8xf32>
    %cst_27 = arith.constant dense<0.000000e+00> : vector<8x8xf32>
    %39 = tpu.matmul %3, %38, %cst_27 {dimension_numbers = #tpu.dot_dimension_numbers<[1], [0], [0], [1], [0, 0, 1, 1], [], []>} : vector<8x32xf32>, vector<32x8xf32>, vector<8x8xf32> -> vector<8x8xf32>
    %c1_28 = arith.constant 1 : index
    %c0_29 = arith.constant 0 : index
    %c0_30 = arith.constant 0 : index
    %40 = vector.load %arg6[%c1_28, %c0_29, %c0_30] : memref<4x32x8xf32, #tpu.memory_space<vmem>>, vector<1x32x8xf32>
    %41 = vector.shape_cast %40 : vector<1x32x8xf32> to vector<32x8xf32>
    %cst_31 = arith.constant dense<0.000000e+00> : vector<8x8xf32>
    %42 = tpu.matmul %1, %41, %cst_31 {dimension_numbers = #tpu.dot_dimension_numbers<[1], [0], [0], [1], [0, 0, 1, 1], [], []>} : vector<8x32xf32>, vector<32x8xf32>, vector<8x8xf32> -> vector<8x8xf32>
    %c1_32 = arith.constant 1 : index
    %c0_33 = arith.constant 0 : index
    %c0_34 = arith.constant 0 : index
    %43 = vector.load %arg7[%c1_32, %c0_33, %c0_34] : memref<4x32x8xf32, #tpu.memory_space<vmem>>, vector<1x32x8xf32>
    %44 = vector.shape_cast %43 : vector<1x32x8xf32> to vector<32x8xf32>
    %cst_35 = arith.constant dense<0.000000e+00> : vector<8x8xf32>
    %45 = tpu.matmul %1, %44, %cst_35 {dimension_numbers = #tpu.dot_dimension_numbers<[1], [0], [0], [1], [0, 0, 1, 1], [], []>} : vector<8x32xf32>, vector<32x8xf32>, vector<8x8xf32> -> vector<8x8xf32>
    %cst_36 = arith.constant 0.353553385 : f32
    %46 = vector.broadcast %cst_36 : f32 to vector<8x8xf32>
    %47 = arith.mulf %39, %46 : vector<8x8xf32>
    %cst_37 = arith.constant dense<0.000000e+00> : vector<8x8xf32>
    %48 = tpu.matmul %47, %42, %cst_37 {dimension_numbers = #tpu.dot_dimension_numbers<[1], [1], [0], [0], [0, 0, 1, 0], [], []>} : vector<8x8xf32>, vector<8x8xf32>, vector<8x8xf32> -> vector<8x8xf32>
    %49 = arith.addf %48, %11 : vector<8x8xf32>
    %cst_38 = arith.constant dense<0xFF800000> : vector<8xf32>
    %50 = vector.multi_reduction <maximumf>, %49, %cst_38 [1] : vector<8x8xf32> to vector<8xf32>
    %51 = vector.shape_cast %50 : vector<8xf32> to vector<8x1xf32>
    %52 = vector.broadcast %51 : vector<8x1xf32> to vector<8x8xf32>
    %53 = arith.subf %49, %52 : vector<8x8xf32>
    %54 = math.exp %53 : vector<8x8xf32>
    %cst_39 = arith.constant dense<0.000000e+00> : vector<8xf32>
    %55 = vector.multi_reduction <add>, %54, %cst_39 [1] : vector<8x8xf32> to vector<8xf32>
    %56 = vector.shape_cast %55 : vector<8xf32> to vector<8x1xf32>
    %57 = tpu.reciprocal %56 {approx = true} : vector<8x1xf32> -> vector<8x1xf32>
    %58 = vector.broadcast %57 : vector<8x1xf32> to vector<8x8xf32>
    %59 = arith.mulf %54, %58 : vector<8x8xf32>
    %cst_40 = arith.constant dense<0.000000e+00> : vector<8x8xf32>
    %60 = tpu.matmul %59, %45, %cst_40 {dimension_numbers = #tpu.dot_dimension_numbers<[1], [0], [0], [1], [0, 0, 1, 1], [], []>} : vector<8x8xf32>, vector<8x8xf32>, vector<8x8xf32> -> vector<8x8xf32>
    %c0_41 = arith.constant 0 : index
    %c8 = arith.constant 8 : index
    %61 = vector.load %arg18[%c0_41, %c8] : memref<8x32xf32, #tpu.memory_space<vmem>>, vector<8x8xf32>
    tpu.vector_store %arg18[%c0_41, %c8], %60 {strides = array<i32>} : memref<8x32xf32, #tpu.memory_space<vmem>>, vector<8x8xf32>,
    %c2 = arith.constant 2 : index
    %c0_42 = arith.constant 0 : index
    %c0_43 = arith.constant 0 : index
    %62 = vector.load %arg5[%c2, %c0_42, %c0_43] : memref<4x32x8xf32, #tpu.memory_space<vmem>>, vector<1x32x8xf32>
    %63 = vector.shape_cast %62 : vector<1x32x8xf32> to vector<32x8xf32>
    %cst_44 = arith.constant dense<0.000000e+00> : vector<8x8xf32>
    %64 = tpu.matmul %3, %63, %cst_44 {dimension_numbers = #tpu.dot_dimension_numbers<[1], [0], [0], [1], [0, 0, 1, 1], [], []>} : vector<8x32xf32>, vector<32x8xf32>, vector<8x8xf32> -> vector<8x8xf32>
    %c2_45 = arith.constant 2 : index
    %c0_46 = arith.constant 0 : index
    %c0_47 = arith.constant 0 : index
    %65 = vector.load %arg6[%c2_45, %c0_46, %c0_47] : memref<4x32x8xf32, #tpu.memory_space<vmem>>, vector<1x32x8xf32>
    %66 = vector.shape_cast %65 : vector<1x32x8xf32> to vector<32x8xf32>
    %cst_48 = arith.constant dense<0.000000e+00> : vector<8x8xf32>
    %67 = tpu.matmul %1, %66, %cst_48 {dimension_numbers = #tpu.dot_dimension_numbers<[1], [0], [0], [1], [0, 0, 1, 1], [], []>} : vector<8x32xf32>, vector<32x8xf32>, vector<8x8xf32> -> vector<8x8xf32>
    %c2_49 = arith.constant 2 : index
    %c0_50 = arith.constant 0 : index
    %c0_51 = arith.constant 0 : index
    %68 = vector.load %arg7[%c2_49, %c0_50, %c0_51] : memref<4x32x8xf32, #tpu.memory_space<vmem>>, vector<1x32x8xf32>
    %69 = vector.shape_cast %68 : vector<1x32x8xf32> to vector<32x8xf32>
    %cst_52 = arith.constant dense<0.000000e+00> : vector<8x8xf32>
    %70 = tpu.matmul %1, %69, %cst_52 {dimension_numbers = #tpu.dot_dimension_numbers<[1], [0], [0], [1], [0, 0, 1, 1], [], []>} : vector<8x32xf32>, vector<32x8xf32>, vector<8x8xf32> -> vector<8x8xf32>
    %cst_53 = arith.constant 0.353553385 : f32
    %71 = vector.broadcast %cst_53 : f32 to vector<8x8xf32>
    %72 = arith.mulf %64, %71 : vector<8x8xf32>
    %cst_54 = arith.constant dense<0.000000e+00> : vector<8x8xf32>
    %73 = tpu.matmul %72, %67, %cst_54 {dimension_numbers = #tpu.dot_dimension_numbers<[1], [1], [0], [0], [0, 0, 1, 0], [], []>} : vector<8x8xf32>, vector<8x8xf32>, vector<8x8xf32> -> vector<8x8xf32>
    %74 = arith.addf %73, %11 : vector<8x8xf32>
    %cst_55 = arith.constant dense<0xFF800000> : vector<8xf32>
    %75 = vector.multi_reduction <maximumf>, %74, %cst_55 [1] : vector<8x8xf32> to vector<8xf32>
    %76 = vector.shape_cast %75 : vector<8xf32> to vector<8x1xf32>
    %77 = vector.broadcast %76 : vector<8x1xf32> to vector<8x8xf32>
    %78 = arith.subf %74, %77 : vector<8x8xf32>
    %79 = math.exp %78 : vector<8x8xf32>
    %cst_56 = arith.constant dense<0.000000e+00> : vector<8xf32>
    %80 = vector.multi_reduction <add>, %79, %cst_56 [1] : vector<8x8xf32> to vector<8xf32>
    %81 = vector.shape_cast %80 : vector<8xf32> to vector<8x1xf32>
    %82 = tpu.reciprocal %81 {approx = true} : vector<8x1xf32> -> vector<8x1xf32>
    %83 = vector.broadcast %82 : vector<8x1xf32> to vector<8x8xf32>
    %84 = arith.mulf %79, %83 : vector<8x8xf32>
    %cst_57 = arith.constant dense<0.000000e+00> : vector<8x8xf32>
    %85 = tpu.matmul %84, %70, %cst_57 {dimension_numbers = #tpu.dot_dimension_numbers<[1], [0], [0], [1], [0, 0, 1, 1], [], []>} : vector<8x8xf32>, vector<8x8xf32>, vector<8x8xf32> -> vector<8x8xf32>
    %c0_58 = arith.constant 0 : index
    %c16 = arith.constant 16 : index
    %86 = vector.load %arg18[%c0_58, %c16] : memref<8x32xf32, #tpu.memory_space<vmem>>, vector<8x8xf32>
    tpu.vector_store %arg18[%c0_58, %c16], %85 {strides = array<i32>} : memref<8x32xf32, #tpu.memory_space<vmem>>, vector<8x8xf32>,
    %c3 = arith.constant 3 : index
    %c0_59 = arith.constant 0 : index
    %c0_60 = arith.constant 0 : index
    %87 = vector.load %arg5[%c3, %c0_59, %c0_60] : memref<4x32x8xf32, #tpu.memory_space<vmem>>, vector<1x32x8xf32>
    %88 = vector.shape_cast %87 : vector<1x32x8xf32> to vector<32x8xf32>
    %cst_61 = arith.constant dense<0.000000e+00> : vector<8x8xf32>
    %89 = tpu.matmul %3, %88, %cst_61 {dimension_numbers = #tpu.dot_dimension_numbers<[1], [0], [0], [1], [0, 0, 1, 1], [], []>} : vector<8x32xf32>, vector<32x8xf32>, vector<8x8xf32> -> vector<8x8xf32>
    %c3_62 = arith.constant 3 : index
    %c0_63 = arith.constant 0 : index
    %c0_64 = arith.constant 0 : index
    %90 = vector.load %arg6[%c3_62, %c0_63, %c0_64] : memref<4x32x8xf32, #tpu.memory_space<vmem>>, vector<1x32x8xf32>
    %91 = vector.shape_cast %90 : vector<1x32x8xf32> to vector<32x8xf32>
    %cst_65 = arith.constant dense<0.000000e+00> : vector<8x8xf32>
    %92 = tpu.matmul %1, %91, %cst_65 {dimension_numbers = #tpu.dot_dimension_numbers<[1], [0], [0], [1], [0, 0, 1, 1], [], []>} : vector<8x32xf32>, vector<32x8xf32>, vector<8x8xf32> -> vector<8x8xf32>
    %c3_66 = arith.constant 3 : index
    %c0_67 = arith.constant 0 : index
    %c0_68 = arith.constant 0 : index
    %93 = vector.load %arg7[%c3_66, %c0_67, %c0_68] : memref<4x32x8xf32, #tpu.memory_space<vmem>>, vector<1x32x8xf32>
    %94 = vector.shape_cast %93 : vector<1x32x8xf32> to vector<32x8xf32>
    %cst_69 = arith.constant dense<0.000000e+00> : vector<8x8xf32>
    %95 = tpu.matmul %1, %94, %cst_69 {dimension_numbers = #tpu.dot_dimension_numbers<[1], [0], [0], [1], [0, 0, 1, 1], [], []>} : vector<8x32xf32>, vector<32x8xf32>, vector<8x8xf32> -> vector<8x8xf32>
    %cst_70 = arith.constant 0.353553385 : f32
    %96 = vector.broadcast %cst_70 : f32 to vector<8x8xf32>
    %97 = arith.mulf %89, %96 : vector<8x8xf32>
    %cst_71 = arith.constant dense<0.000000e+00> : vector<8x8xf32>
    %98 = tpu.matmul %97, %92, %cst_71 {dimension_numbers = #tpu.dot_dimension_numbers<[1], [1], [0], [0], [0, 0, 1, 0], [], []>} : vector<8x8xf32>, vector<8x8xf32>, vector<8x8xf32> -> vector<8x8xf32>
    %99 = arith.addf %98, %11 : vector<8x8xf32>
    %cst_72 = arith.constant dense<0xFF800000> : vector<8xf32>
    %100 = vector.multi_reduction <maximumf>, %99, %cst_72 [1] : vector<8x8xf32> to vector<8xf32>
    %101 = vector.shape_cast %100 : vector<8xf32> to vector<8x1xf32>
    %102 = vector.broadcast %101 : vector<8x1xf32> to vector<8x8xf32>
    %103 = arith.subf %99, %102 : vector<8x8xf32>
    %104 = math.exp %103 : vector<8x8xf32>
    %cst_73 = arith.constant dense<0.000000e+00> : vector<8xf32>
    %105 = vector.multi_reduction <add>, %104, %cst_73 [1] : vector<8x8xf32> to vector<8xf32>
    %106 = vector.shape_cast %105 : vector<8xf32> to vector<8x1xf32>
    %107 = tpu.reciprocal %106 {approx = true} : vector<8x1xf32> -> vector<8x1xf32>
    %108 = vector.broadcast %107 : vector<8x1xf32> to vector<8x8xf32>
    %109 = arith.mulf %104, %108 : vector<8x8xf32>
    %cst_74 = arith.constant dense<0.000000e+00> : vector<8x8xf32>
    %110 = tpu.matmul %109, %95, %cst_74 {dimension_numbers = #tpu.dot_dimension_numbers<[1], [0], [0], [1], [0, 0, 1, 1], [], []>} : vector<8x8xf32>, vector<8x8xf32>, vector<8x8xf32> -> vector<8x8xf32>
    %c0_75 = arith.constant 0 : index
    %c24 = arith.constant 24 : index
    %111 = vector.load %arg18[%c0_75, %c24] : memref<8x32xf32, #tpu.memory_space<vmem>>, vector<8x8xf32>
    tpu.vector_store %arg18[%c0_75, %c24], %110 {strides = array<i32>} : memref<8x32xf32, #tpu.memory_space<vmem>>, vector<8x8xf32>,
    %c0_76 = arith.constant 0 : index
    %c0_77 = arith.constant 0 : index
    %112 = vector.load %arg18[%c0_76, %c0_77] : memref<8x32xf32, #tpu.memory_space<vmem>>, vector<8x32xf32>
    %c0_78 = arith.constant 0 : index
    %c0_79 = arith.constant 0 : index
    %113 = vector.load %arg8[%c0_78, %c0_79] : memref<32x32xf32, #tpu.memory_space<vmem>>, vector<32x32xf32>
    %cst_80 = arith.constant dense<0.000000e+00> : vector<8x32xf32>
    %114 = tpu.matmul %112, %113, %cst_80 {dimension_numbers = #tpu.dot_dimension_numbers<[1], [0], [0], [1], [0, 0, 1, 1], [], []>} : vector<8x32xf32>, vector<32x32xf32>, vector<8x32xf32> -> vector<8x32xf32>
    %115 = arith.addf %114, %3 : vector<8x32xf32>
    %c0_81 = arith.constant 0 : index
    %c0_82 = arith.constant 0 : index
    %116 = vector.load %arg9[%c0_81, %c0_82] : memref<1x32xf32, #tpu.memory_space<vmem>>, vector<1x32xf32>
    %c0_83 = arith.constant 0 : index
    %c0_84 = arith.constant 0 : index
    %117 = vector.load %arg10[%c0_83, %c0_84] : memref<1x32xf32, #tpu.memory_space<vmem>>, vector<1x32xf32>
    %cst_85 = arith.constant dense<0.000000e+00> : vector<8xf32>
    %118 = vector.multi_reduction <add>, %115, %cst_85 [1] : vector<8x32xf32> to vector<8xf32>
    %119 = vector.shape_cast %118 : vector<8xf32> to vector<8x1xf32>
    %cst_86 = arith.constant 3.200000e+01 : f32
    %120 = vector.broadcast %cst_86 : f32 to vector<8x1xf32>
    %121 = arith.divf %119, %120 : vector<8x1xf32>
    %122 = vector.broadcast %121 : vector<8x1xf32> to vector<8x32xf32>
    %123 = arith.subf %115, %122 : vector<8x32xf32>
    %124 = arith.mulf %123, %123 : vector<8x32xf32>
    %cst_87 = arith.constant dense<0.000000e+00> : vector<8xf32>
    %125 = vector.multi_reduction <add>, %124, %cst_87 [1] : vector<8x32xf32> to vector<8xf32>
    %126 = vector.shape_cast %125 : vector<8xf32> to vector<8x1xf32>
    %cst_88 = arith.constant 3.200000e+01 : f32
    %127 = vector.broadcast %cst_88 : f32 to vector<8x1xf32>
    %128 = arith.divf %126, %127 : vector<8x1xf32>
    %cst_89 = arith.constant 9.99999974E-6 : f32
    %129 = vector.broadcast %cst_89 : f32 to vector<8x1xf32>
    %130 = arith.addf %128, %129 : vector<8x1xf32>
    %131 = math.rsqrt %130 : vector<8x1xf32>
    %132 = vector.broadcast %131 : vector<8x1xf32> to vector<8x32xf32>
    %133 = arith.mulf %123, %132 : vector<8x32xf32>
    %134 = vector.broadcast %116 : vector<1x32xf32> to vector<8x32xf32>
    %135 = arith.mulf %133, %134 : vector<8x32xf32>
    %136 = vector.broadcast %117 : vector<1x32xf32> to vector<8x32xf32>
    %137 = arith.addf %135, %136 : vector<8x32xf32>
    %c0_90 = arith.constant 0 : index
    %c0_91 = arith.constant 0 : index
    %138 = vector.load %arg11[%c0_90, %c0_91] : memref<32x64xf32, #tpu.memory_space<vmem>>, vector<32x64xf32>
    %cst_92 = arith.constant dense<0.000000e+00> : vector<8x64xf32>
    %139 = tpu.matmul %137, %138, %cst_92 {dimension_numbers = #tpu.dot_dimension_numbers<[1], [0], [0], [1], [0, 0, 1, 1], [], []>} : vector<8x32xf32>, vector<32x64xf32>, vector<8x64xf32> -> vector<8x64xf32>
    %c0_93 = arith.constant 0 : index
    %c0_94 = arith.constant 0 : index
    %140 = vector.load %arg12[%c0_93, %c0_94] : memref<1x64xf32, #tpu.memory_space<vmem>>, vector<1x64xf32>
    %141 = vector.broadcast %140 : vector<1x64xf32> to vector<8x64xf32>
    %142 = arith.addf %139, %141 : vector<8x64xf32>
    %cst_95 = arith.constant 0.000000e+00 : f32
    %143 = vector.broadcast %cst_95 : f32 to vector<8x64xf32>
    %144 = arith.maximumf %142, %143 : vector<8x64xf32>
    %c0_96 = arith.constant 0 : index
    %c0_97 = arith.constant 0 : index
    %145 = vector.load %arg13[%c0_96, %c0_97] : memref<64x32xf32, #tpu.memory_space<vmem>>, vector<64x32xf32>
    %cst_98 = arith.constant dense<0.000000e+00> : vector<8x32xf32>
    %146 = tpu.matmul %144, %145, %cst_98 {dimension_numbers = #tpu.dot_dimension_numbers<[1], [0], [0], [1], [0, 0, 1, 1], [], []>} : vector<8x64xf32>, vector<64x32xf32>, vector<8x32xf32> -> vector<8x32xf32>
    %c0_99 = arith.constant 0 : index
    %c0_100 = arith.constant 0 : index
    %147 = vector.load %arg14[%c0_99, %c0_100] : memref<1x32xf32, #tpu.memory_space<vmem>>, vector<1x32xf32>
    %148 = vector.broadcast %147 : vector<1x32xf32> to vector<8x32xf32>
    %149 = arith.addf %146, %148 : vector<8x32xf32>
    %150 = arith.addf %149, %137 : vector<8x32xf32>
    %c0_101 = arith.constant 0 : index
    %c0_102 = arith.constant 0 : index
    %151 = vector.load %arg15[%c0_101, %c0_102] : memref<1x32xf32, #tpu.memory_space<vmem>>, vector<1x32xf32>
    %c0_103 = arith.constant 0 : index
    %c0_104 = arith.constant 0 : index
    %152 = vector.load %arg16[%c0_103, %c0_104] : memref<1x32xf32, #tpu.memory_space<vmem>>, vector<1x32xf32>
    %cst_105 = arith.constant dense<0.000000e+00> : vector<8xf32>
    %153 = vector.multi_reduction <add>, %150, %cst_105 [1] : vector<8x32xf32> to vector<8xf32>
    %154 = vector.shape_cast %153 : vector<8xf32> to vector<8x1xf32>
    %cst_106 = arith.constant 3.200000e+01 : f32
    %155 = vector.broadcast %cst_106 : f32 to vector<8x1xf32>
    %156 = arith.divf %154, %155 : vector<8x1xf32>
    %157 = vector.broadcast %156 : vector<8x1xf32> to vector<8x32xf32>
    %158 = arith.subf %150, %157 : vector<8x32xf32>
    %159 = arith.mulf %158, %158 : vector<8x32xf32>
    %cst_107 = arith.constant dense<0.000000e+00> : vector<8xf32>
    %160 = vector.multi_reduction <add>, %159, %cst_107 [1] : vector<8x32xf32> to vector<8xf32>
    %161 = vector.shape_cast %160 : vector<8xf32> to vector<8x1xf32>
    %cst_108 = arith.constant 3.200000e+01 : f32
    %162 = vector.broadcast %cst_108 : f32 to vector<8x1xf32>
    %163 = arith.divf %161, %162 : vector<8x1xf32>
    %cst_109 = arith.constant 9.99999974E-6 : f32
    %164 = vector.broadcast %cst_109 : f32 to vector<8x1xf32>
    %165 = arith.addf %163, %164 : vector<8x1xf32>
    %166 = math.rsqrt %165 : vector<8x1xf32>
    %167 = vector.broadcast %166 : vector<8x1xf32> to vector<8x32xf32>
    %168 = arith.mulf %158, %167 : vector<8x32xf32>
    %169 = vector.broadcast %151 : vector<1x32xf32> to vector<8x32xf32>
    %170 = arith.mulf %168, %169 : vector<8x32xf32>
    %171 = vector.broadcast %152 : vector<1x32xf32> to vector<8x32xf32>
    %172 = arith.addf %170, %171 : vector<8x32xf32>
    %c0_110 = arith.constant 0 : index
    %c0_111 = arith.constant 0 : index
    %c0_112 = arith.constant 0 : index
    %173 = vector.load %arg17[%c0_110, %c0_111, %c0_112] : memref<1x8x32xf32, #tpu.memory_space<vmem>>, vector<1x8x32xf32>
    %174 = vector.shape_cast %173 : vector<1x8x32xf32> to vector<8x32xf32>
    %175 = vector.shape_cast %172 : vector<8x32xf32> to vector<1x8x32xf32>
    tpu.vector_store %arg17[%c0_110, %c0_111, %c0_112], %175 {strides = array<i32>} : memref<1x8x32xf32, #tpu.memory_space<vmem>>, vector<1x8x32xf32>,
    return
  }
  func.func @transform_0(%arg0: i32, %arg1: i32, %arg2: memref<2xi32, #tpu.memory_space<smem>>) -> (i32, i32, i32) {
    %c0_i32 = arith.constant 0 : i32
    %c0_i32_0 = arith.constant 0 : i32
    %c0_i32_1 = arith.constant 0 : i32
    return %arg0, %c0_i32, %c0_i32_0 : i32, i32, i32
  }
  func.func @transform_1(%arg0: i32, %arg1: i32, %arg2: memref<2xi32, #tpu.memory_space<smem>>) -> (i32, i32, i32) {
    %c0_i32 = arith.constant 0 : i32
    %c0_i32_0 = arith.constant 0 : i32
    return %arg0, %arg1, %c0_i32 : i32, i32, i32
  }
  func.func @transform_2(%arg0: i32, %arg1: i32, %arg2: memref<2xi32, #tpu.memory_space<smem>>) -> (i32, i32, i32) {
    %c0_i32 = arith.constant 0 : i32
    %c0_i32_0 = arith.constant 0 : i32
    %c0_i32_1 = arith.constant 0 : i32
    %c0_i32_2 = arith.constant 0 : i32
    return %c0_i32, %c0_i32_0, %c0_i32_1 : i32, i32, i32
  }
  func.func @transform_3(%arg0: i32, %arg1: i32, %arg2: memref<2xi32, #tpu.memory_space<smem>>) -> (i32, i32, i32) {
    %c0_i32 = arith.constant 0 : i32
    %c0_i32_0 = arith.constant 0 : i32
    %c0_i32_1 = arith.constant 0 : i32
    %c0_i32_2 = arith.constant 0 : i32
    return %c0_i32, %c0_i32_0, %c0_i32_1 : i32, i32, i32
  }
  func.func @transform_4(%arg0: i32, %arg1: i32, %arg2: memref<2xi32, #tpu.memory_space<smem>>) -> (i32, i32, i32) {
    %c0_i32 = arith.constant 0 : i32
    %c0_i32_0 = arith.constant 0 : i32
    %c0_i32_1 = arith.constant 0 : i32
    %c0_i32_2 = arith.constant 0 : i32
    return %c0_i32, %c0_i32_0, %c0_i32_1 : i32, i32, i32
  }
  func.func @transform_5(%arg0: i32, %arg1: i32, %arg2: memref<2xi32, #tpu.memory_space<smem>>) -> (i32, i32) {
    %c0_i32 = arith.constant 0 : i32
    %c0_i32_0 = arith.constant 0 : i32
    %c0_i32_1 = arith.constant 0 : i32
    return %c0_i32, %c0_i32_0 : i32, i32
  }
  func.func @transform_6(%arg0: i32, %arg1: i32, %arg2: memref<2xi32, #tpu.memory_space<smem>>) -> (i32, i32) {
    %c0_i32 = arith.constant 0 : i32
    %c0_i32_0 = arith.constant 0 : i32
    %c0_i32_1 = arith.constant 0 : i32
    return %c0_i32, %c0_i32_0 : i32, i32
  }
  func.func @transform_7(%arg0: i32, %arg1: i32, %arg2: memref<2xi32, #tpu.memory_space<smem>>) -> (i32, i32) {
    %c0_i32 = arith.constant 0 : i32
    %c0_i32_0 = arith.constant 0 : i32
    %c0_i32_1 = arith.constant 0 : i32
    return %c0_i32, %c0_i32_0 : i32, i32
  }
  func.func @transform_8(%arg0: i32, %arg1: i32, %arg2: memref<2xi32, #tpu.memory_space<smem>>) -> (i32, i32) {
    %c0_i32 = arith.constant 0 : i32
    %c0_i32_0 = arith.constant 0 : i32
    %c0_i32_1 = arith.constant 0 : i32
    return %c0_i32, %c0_i32_0 : i32, i32
  }
  func.func @transform_9(%arg0: i32, %arg1: i32, %arg2: memref<2xi32, #tpu.memory_space<smem>>) -> (i32, i32) {
    %c0_i32 = arith.constant 0 : i32
    %c0_i32_0 = arith.constant 0 : i32
    %c0_i32_1 = arith.constant 0 : i32
    return %c0_i32, %c0_i32_0 : i32, i32
  }
  func.func @transform_10(%arg0: i32, %arg1: i32, %arg2: memref<2xi32, #tpu.memory_space<smem>>) -> (i32, i32) {
    %c0_i32 = arith.constant 0 : i32
    %c0_i32_0 = arith.constant 0 : i32
    %c0_i32_1 = arith.constant 0 : i32
    return %c0_i32, %c0_i32_0 : i32, i32
  }
  func.func @transform_11(%arg0: i32, %arg1: i32, %arg2: memref<2xi32, #tpu.memory_space<smem>>) -> (i32, i32) {
    %c0_i32 = arith.constant 0 : i32
    %c0_i32_0 = arith.constant 0 : i32
    %c0_i32_1 = arith.constant 0 : i32
    return %c0_i32, %c0_i32_0 : i32, i32
  }
  func.func @transform_12(%arg0: i32, %arg1: i32, %arg2: memref<2xi32, #tpu.memory_space<smem>>) -> (i32, i32) {
    %c0_i32 = arith.constant 0 : i32
    %c0_i32_0 = arith.constant 0 : i32
    %c0_i32_1 = arith.constant 0 : i32
    return %c0_i32, %c0_i32_0 : i32, i32
  }
  func.func @transform_13(%arg0: i32, %arg1: i32, %arg2: memref<2xi32, #tpu.memory_space<smem>>) -> (i32, i32) {
    %c0_i32 = arith.constant 0 : i32
    %c0_i32_0 = arith.constant 0 : i32
    %c0_i32_1 = arith.constant 0 : i32
    return %c0_i32, %c0_i32_0 : i32, i32
  }
  func.func @transform_14(%arg0: i32, %arg1: i32, %arg2: memref<2xi32, #tpu.memory_space<smem>>) -> (i32, i32, i32) {
    %c0_i32 = arith.constant 0 : i32
    %c0_i32_0 = arith.constant 0 : i32
    return %arg0, %arg1, %c0_i32 : i32, i32, i32
  }
}

</mosaic_0001>

<bundles_post_ra>
// kernel: tpu_custom_call.1
= control target key start
LH: loop header
LB: loop body
LE: loop exit
PB: predicated region body
PF: predicated region fallthrough
CT: control target
= control target key end

     0   :  { %s3650_s0 = inlined_call_operand.vmem [shape: s32[2], index: 0, kind: input, shape index: {}]   ;;  %s3651_s1 = inlined_call_operand.vmem [shape: f32[2,8,32], index: 1, kind: input, shape index: {}]   ;;  %s3652_s2 = inlined_call_operand.vmem [shape: f32[2,8,32], index: 2, kind: input, shape index: {}]   ;;  %s3653_s3 = inlined_call_operand.vmem [shape: f32[4,32,8], index: 3, kind: input, shape index: {}]   ;;  %s3654_s4 = inlined_call_operand.vmem [shape: f32[4,32,8], index: 4, kind: input, shape index: {}]   ;;  %s3655_s5 = inlined_call_operand.vmem [shape: f32[4,32,8], index: 5, kind: input, shape index: {}]   ;;  %s3656_s6 = inlined_call_operand.vmem [shape: f32[32,32], index: 6, kind: input, shape index: {}]   ;;  %s3657_s7 = inlined_call_operand.vmem [shape: f32[1,32], index: 7, kind: input, shape index: {}]   ;;  %s3658_s8 = inlined_call_operand.vmem [shape: f32[1,32], index: 8, kind: input, shape index: {}]   ;;  %s3659_s9 = inlined_call_operand.vmem [shape: f32[32,64], index: 9, kind: input, shape index: {}]   ;;  %s3660_s10 = inlined_call_operand.vmem [shape: f32[1,64], index: 10, kind: input, shape index: {}]   ;;  %s3661_s11 = inlined_call_operand.vmem [shape: f32[64,32], index: 11, kind: input, shape index: {}]   ;;  %s3662_s12 = inlined_call_operand.vmem [shape: f32[1,32], index: 12, kind: input, shape index: {}]   ;;  %s3663_s13 = inlined_call_operand.vmem [shape: f32[1,32], index: 13, kind: input, shape index: {}]   ;;  %s3664_s14 = inlined_call_operand.vmem [shape: f32[1,32], index: 14, kind: input, shape index: {}]   ;;  %s3665_s15 = inlined_call_operand.hbm [shape: f32[2,8,32], index: 15, kind: output, shape index: {}]  }
   0x1   :  { %3668 = sst [smem:[#allocation12_spill]] %s3651_s1  ;;  %s20_s20 = sshll.u32 %s3650_s0, 4  ;;  %s21_s20 = int_to_ptr.vmem [resolvable:$true] %s20_s20 }
   0x2   :  { %3669 = sst [smem:[#allocation13_spill]] %s3652_s2  ;;  %s2970_s21 = scalar_lea.vmem %s21_s20, 16 }
   0x3   :  { %3670 = sst [smem:[#allocation14_spill]] %s3653_s3  ;;  %p2971_p0 = scmp.ne.s32.totalorder %s21_s20, %s2970_s21 }
   0x4   :  { %3671 = sst [smem:[#allocation15_spill]] %s3654_s4  ;;  %p2975_p1 = scmp.lt.s32.totalorder %s21_s20, %s21_s20 }
   0x5   :  { %p2976_p2 = scmp.lt.s32.totalorder %s2970_s21, %s2970_s21 }
   0x7   :  { %p2977_p3 = por %p2976_p2, %p2975_p1 }
   0x9   :  { %p2978_p4 = pnand %p2977_p3, %p2971_p0 }
   0xb   :  { %2981 = shalt.err (!%p2978_p4)  }
   0xc   :  { %s3062_s22 = smov [#allocation4]  }
   0xd   :  { %23 = dma.vmem_to_smem %s21_s20, 16, %s3062_s22, [#allocation3] }
   0xe   :  { %3032 = dma.done.wait [#allocation3], 16 }
   0xf   :  { %3033 = vsyncadd [#allocation3], 4294967280 }
  0x10   :  { %25 = sfence }
  0x11   :  { %26 = vsyncpa [#allocation6], 0 }
  0x12   :  { %28 = vsyncpa [#allocation6 + $0x1], 0  ;;  %s3153_s23 = smov 0   ;;  %s3155_s24 = smov 0  }
  0x13   :  { %s3157_s0 = smov 0   ;;  %s3159_s25 = smov 0  }
  0x14   :  { %s3161_s26 = smov 0   ;;  %s3163_s27 = smov 0  }
  0x15 LB: > { %3672 = sst [smem:[#allocation9_spill]] %s3056_s26  ;;  %s2499_s28 = sadd.s32 4294967295, %s3060_s27   ;;  %s3060_s27 = sphi %s3163_s27, %s34_s27   ;;  %s3056_s26 = sphi %s3161_s26, %s3683_s26   ;;  %s3052_s25 = sphi %s3159_s25, %s3682_s25   ;;  %s3048_s0 = sphi %s3157_s0, %s3686_s0   ;;  %s3044_s24 = sphi %s3155_s24, %s3685_s24   ;;  %s3040_s23 = sphi %s3153_s23, %s3684_s23  }
  0x16   : > { %s2500_s29 = sadd.s32 4294967294, %s3060_s27   ;;  %s46_s30 = sadd.s32 1, %s3056_s26 }
  0x17   : > { %s361_s16 = sadd.s32 1, %s3048_s0  ;;  %p48_p5 = scmp.ge.s32.totalorder %s46_s30, 2 }
  0x18   : > { %p371_p6 = scmp.ne.s32.totalorder %s3048_s0, %s3044_s24  ;;  %p372_p7 = scmp.eq.s32.totalorder %s2499_s28, 1 }
  0x19   : > { %p377_p8 = scmp.ne.s32.totalorder %s3044_s24, %s3040_s23  ;;  %s3688_s30 = smov (%p48_p5, %s46_s30), 0 }
  0x1a   : > { %3673 = sst [smem:[#allocation10_spill]] %s3688_s30  ;;  %p3193_p9 = por %p372_p7, %p371_p6 }
  0x1b   : > { %p378_p10 = scmp.eq.s32.totalorder %s2500_s29, 1  ;;  %s356_s18 = ssub.s32 %s3056_s26, %s3688_s30 }
  0x1c   : > { %p2503_p11 = scmp.ge.s32.totalorder %s3060_s27, 1  ;;  %p359_p12 = scmp.eq.s32.totalorder %s356_s18, 0 }
  0x1d   : > { %p3200_p13 = por %p378_p10, %p377_p8  ;;  %p449_p0 = scmp.lt.s32.totalorder %s3060_s27, 3 }
  0x1e   : > { %s3206_s20 = scalar_select %p359_p12, %s3048_s0, %s361_s16  }
  0x1f   : > { %p450_p1 = pnand %p2503_p11, %p449_p0 }
  0x20   : > { %3676 = sst [smem:[#allocation11_spill]] %s3206_s20  ;;  %p501_p2 = scmp.lt.s32.totalorder (!%p450_p1), %s3052_s25, 1 }
  0x21   : > { %453 = sbr.rel (%p450_p1) target bundleno = 4425 (0x1149), region = 76  ;;  %s3677_s3 = sld [smem:[#allocation14_spill]] (!%p450_p1) }
  0x22   : > { %s3678_s2 = sld [smem:[#allocation13_spill]] (!%p450_p1)  ;;  %s3067_s28 = smov (!%p450_p1), 16  }
  0x23   : > { %s3679_s4 = sld [smem:[#allocation15_spill]] (!%p450_p1)  ;;  %s498_s21 = sand.u32 (!%p450_p1), 1, %s3044_s24  }
  0x24   : > { %s3680_s1 = sld [smem:[#allocation12_spill]] (!%p450_p1) }
  0x26   : > { %v3063_v1 = vmov 0.0   ;;  %vm3064_vm0 = vmmov 0   ;;  %s502_s16 = scalar_select %p501_p2, %s3052_s25, 1  ;;  %vm524_vm1 = vcmask 261120   ;;  %vm750_vm2 = vcmask 64512   ;;  %v678_v16 = vld [vmem:[%s3655_s5 + $0x18] sm:$0xff] }
  0x27   : > { %v523_v0 = vld [vmem:[%s3677_s3 + $0x18] sm:$0xff]  ;;  %2675 = vmatprep.subr.mxu1 %v3063_v1  ;;  %v522_v2 = vld [vmem:[%s3677_s3 + $0x10] sm:$0xff]  ;;  %2683 = vmatprep.mubr.msk.f32.mxu1 %vm3064_vm0, %v3063_v1  ;;  %v521_v3 = vld [vmem:[%s3677_s3 + $0x8] sm:$0xff]  ;;  %v515_v20 = vlaneseq  ;;  %v3065_v23 = vmov -1000000.0   ;;  %vm1302_vm4 = vcmask 130112  }
  0x28   : > { %2676 = vmatpush3.msra.mxu1 %v523_v0  ;;  %2697 = vmatprep.subr.mxu0 %v3063_v1  ;;  %s2505_s22 = sshll.u32 %s502_s16, 3  ;;  %v520_v4 = vld [vmem:[%s3677_s3] sm:$0xff]  ;;  %v677_v17 = vld [vmem:[%s3655_s5 + $0x10] sm:$0xff]  ;;  %v676_v18 = vld [vmem:[%s3655_s5 + $0x8] sm:$0xff]  ;;  %s514_s16 = sld [smem:[#allocation4 + %s3052_s25]]  ;;  %vm1694_vm5 = vcmask 195712  }
  0x29   : > { %2677 = vmatprep.subr.mxu1 %v3063_v1  ;;  %2705 = vmatprep.mubr.msk.f32.mxu0 %vm3064_vm0, %v3063_v1  ;;  %s511_s20 = scalar_lea.vmem %s3678_s2, %s2505_s22  ;;  %v601_v6 = vld [vmem:[%s3679_s4 + $0x18] sm:$0xff]  ;;  %v600_v7 = vld [vmem:[%s3679_s4 + $0x10] sm:$0xff]  ;;  %v599_v8 = vld [vmem:[%s3679_s4 + $0x8] sm:$0xff]  ;;  %v516_v21 = vand.u32 127, %v515_v20  ;;  %vm2086_vm6 = vcmask 261312   ;;  %vm2296_vm7 = vcmask 523264  }
  0x2a   : > { %2678 = vmatpush3.msra.mxu1 %v522_v2  ;;  %v3233_v5 = vld [vmem:[%s511_s20] sm:$0xff]  ;;  %s504_s20 = scalar_lea.vmem %s3680_s1, %s2505_s22  ;;  %2698 = vmatpush3.msra.mxu0 %v678_v16  ;;  %v2516_v35 = vld [vmem:[%s3677_s3 + $0x38] sm:$0xff]  ;;  %v2515_v37 = vld [vmem:[%s3677_s3 + $0x30] sm:$0xff]  ;;  %s3066_s22 = smov 8  }
  0x2b   : > { %2679 = vmatprep.subr.mxu1 %v3063_v1  ;;  %v598_v9 = vld [vmem:[%s3679_s4] sm:$0xff]  ;;  %2699 = vmatprep.subr.mxu0 %v3063_v1  ;;  %v2514_v38 = vld [vmem:[%s3677_s3 + $0x28] sm:$0xff]  ;;  %v2521_v43 = vld [vmem:[%s3679_s4 + $0x38] sm:$0xff] }
  0x2c   : > { %2680 = vmatpush3.msra.mxu1 %v521_v3  ;;  %v3258_v10 = vld [vmem:[%s504_s20] sm:$0xff]  ;;  %2700 = vmatpush3.msra.mxu0 %v677_v17  ;;  %v2520_v44 = vld [vmem:[%s3679_s4 + $0x30] sm:$0xff]  ;;  %v2519_v45 = vld [vmem:[%s3679_s4 + $0x28] sm:$0xff]  ;;  %s2577_s20 = sshll.u32 %s3052_s25, 7 }
  0x2d   : > { %2681 = vmatprep.subr.mxu1 %v3063_v1  ;;  %2701 = vmatprep.subr.mxu0 %v3063_v1  ;;  %v675_v19 = vld [vmem:[%s3655_s5] sm:$0xff]  ;;  %v2526_v54 = vld [vmem:[%s3655_s5 + $0x38] sm:$0xff]  ;;  %v2525_v55 = vld [vmem:[%s3655_s5 + $0x30] sm:$0xff] }
  0x2e   : > { %2682 = vmatpush3.msra.mxu1 %v520_v4  ;;  %2702 = vmatpush3.msra.mxu0 %v676_v18  ;;  %v517_v22 = vstv %s514_s16  ;;  %v2513_v39 = vld [vmem:[%s3677_s3 + $0x20] sm:$0xff]  ;;  %v2524_v56 = vld [vmem:[%s3655_s5 + $0x28] sm:$0xff]  ;;  %v2538_v16 = vld [vmem:[%s3679_s4 + $0x50] sm:$0xff]  ;;  %s2504_s16 = sshll.u32 %s498_s21, 3 }
  0x2f   : > { %2684 = vmatmul.mubr.msk.f32.vlgmr.msra.gmra.mxu1 %vm524_vm1, %v3233_v5  ;;  %2686 = vmatprep.subr.mxu1 %v3063_v1  ;;  %vm518_vm3 = vcmp.lt.s32.totalorder %v516_v21, %v517_v22  ;;  %v2518_v46 = vld [vmem:[%s3679_s4 + $0x20] sm:$0xff]  ;;  %v2537_v17 = vld [vmem:[%s3679_s4 + $0x48] sm:$0xff]  ;;  %s500_s29 = scalar_lea.vmem [#allocation5], %s2504_s16 }
  0x30   : > { %2687 = vmatpush3.msra.mxu1 %v601_v6  ;;  %2694 = vmatprep.mubr.msk.f32.mxu1 %vm3064_vm0, %v3063_v1  ;;  %v3292_v24 = vsel %vm518_vm3, 0.0, %v3065_v23  ;;  %v2523_v57 = vld [vmem:[%s3655_s5 + $0x20] sm:$0xff]  ;;  %v2534_v6 = vld [vmem:[%s3677_s3 + $0x58] sm:$0xff]  ;;  %s2416_s18 = sshll.u32 %s500_s29, 4  ;;  %s2417_s18 = int_to_ptr.vmem [resolvable:$true] %s2416_s18 }
  0x31   : > { %2688 = vmatprep.subr.mxu1 %v3063_v1  ;;  %2703 = vmatprep.subr.mxu0 %v3063_v1  ;;  %v2536_v18 = vld [vmem:[%s3679_s4 + $0x40] sm:$0xff] }
  0x32   : > { %2689 = vmatpush3.msra.mxu1 %v600_v7  ;;  %2704 = vmatpush3.msra.mxu0 %v675_v19 }
  0x33   : > { %2690 = vmatprep.subr.mxu1 %v3063_v1  ;;  %2706 = vmatmul.mubr.msk.f32.vlgmr.msra.gmra.mxu0 %vm524_vm1, %v3258_v10 }
  0x34   : > { %2691 = vmatpush3.msra.mxu1 %v599_v8  ;;  %2718 = vmatprep.subr.mxu0 %v3063_v1  ;;  %v2533_v8 = vld [vmem:[%s3677_s3 + $0x50] sm:$0xff] }
  0x35   : > { %2692 = vmatprep.subr.mxu1 %v3063_v1  ;;  %2726 = vmatprep.mubr.msk.f32.mxu0 %vm3064_vm0, %v3063_v1 }
  0x36   : > { %2693 = vmatpush3.msra.mxu1 %v598_v9  ;;  %2719 = vmatpush3.msra.mxu0 %v2516_v35  ;;  %v2532_v9 = vld [vmem:[%s3677_s3 + $0x48] sm:$0xff] }
  0x37   : > { %2695 = vmatmul.mubr.msk.f32.vlgmr.msra.gmra.mxu1 %vm524_vm1, %v3258_v10  ;;  %2708 = vmatprep.subr.mxu1 %v3063_v1 }
  0x38   : > { %2710 = vmatprep.mubr.msk.f32.mxu1 %vm3064_vm0, %v3063_v1  ;;  %2720 = vmatprep.subr.mxu0 %v3063_v1 }
  0x39   : > { %2721 = vmatpush3.msra.mxu0 %v2515_v37 }
  0x3a   : > { %2722 = vmatprep.subr.mxu0 %v3063_v1 }
  0x3b   : > { %2723 = vmatpush3.msra.mxu0 %v2514_v38 }
  0x3c   : > { %2724 = vmatprep.subr.mxu0 %v3063_v1 }
  0x3d   : > { %2725 = vmatpush3.msra.mxu0 %v2513_v39 }
  0x3e   : > { %2727 = vmatmul.mubr.msk.f32.vlgmr.msra.gmra.mxu0 %vm524_vm1, %v3233_v5  ;;  %2740 = vmatprep.subr.mxu0 %v3063_v1 }
  0x3f   : > { %2748 = vmatprep.mubr.msk.f32.mxu0 %vm3064_vm0, %v3063_v1  ;;  %2741 = vmatpush3.msra.mxu0 %v2526_v54 }
  0x40   : > { %2742 = vmatprep.subr.mxu0 %v3063_v1 }
  0x41   : > { %2743 = vmatpush3.msra.mxu0 %v2525_v55 }
  0x42   : > { %2744 = vmatprep.subr.mxu0 %v3063_v1 }
  0x43   : > { %2745 = vmatpush3.msra.mxu0 %v2524_v56 }
  0x44   : > { %2746 = vmatprep.subr.mxu0 %v3063_v1 }
  0x45   : > { %2747 = vmatpush3.msra.mxu0 %v2523_v57 }
  0x46   : > { %2749 = vmatmul.mubr.msk.f32.vlgmr.msra.gmra.mxu0 %vm524_vm1, %v3258_v10  ;;  %2761 = vmatprep.subr.mxu0 %v3063_v1 }
  0x47   : > { %2769 = vmatprep.mubr.msk.f32.mxu0 %vm3064_vm0, %v3063_v1  ;;  %2762 = vmatpush3.msra.mxu0 %v2534_v6 }
  0x48   : > { %2763 = vmatprep.subr.mxu0 %v3063_v1 }
  0x49   : > { %2764 = vmatpush3.msra.mxu0 %v2533_v8 }
  0x4a   : > { %2765 = vmatprep.subr.mxu0 %v3063_v1 }
  0x4b   : > { %2766 = vmatpush3.msra.mxu0 %v2532_v9 }
  0x4c   : > { %2767 = vmatprep.subr.mxu0 %v3063_v1 }
  0xef   : > { %v594_v11 = vpop.f32.mrf.mxu1 }
  0xf0   : > { %v749_v14 = vmul.f32 0.35355338, %v594_v11  ;;  %v2531_v11 = vld [vmem:[%s3677_s3 + $0x40] sm:$0xff] }
  0xf1   : > { %v2685_v12 = vpop.f32.mrf.mxu1  ;;  %2768 = vmatpush3.msra.mxu0 %v2531_v11 }
  0xf2   : > { %2770 = vmatmul.mubr.msk.f32.vlgmr.msra.gmra.mxu0 %vm524_vm1, %v3233_v5  ;;  %2783 = vmatprep.subr.mxu0 %v3063_v1 }
  0xf3   : > { %v745_v34 = vpop.f32.mrf.mxu0  ;;  %2791 = vmatprep.mubr.msk.f32.mxu0 %vm3064_vm0, %v3063_v1 }
  0xf5   : > { %v2707_v36 = vpop.f32.mrf.mxu0 }
  0xf7   : > { %v671_v13 = vpop.f32.mrf.mxu1 }
  0xf8   : > { %2709 = vmatpush3.xpose.msk.msra.mxu1 %vm750_vm2, %v671_v13 }
  0xf9   : > { %v2696_v15 = vpop.f32.mrf.mxu1  ;;  %2713 = vmatprep.subr.mxu1 %v3063_v1 }
  0xfa   : > { %v2539_v15 = vld [vmem:[%s3679_s4 + $0x58] sm:$0xff] }
  0xfb   : > { %2711 = vmatmul.mubr.msk.f32.vlgmr.msra.gmra.mxu1 %vm750_vm2, %v749_v14 }
  0xfc   : > { %2715 = vmatprep.mubr.msk.f32.mxu1 %vm3064_vm0, %v3063_v1  ;;  %2714 = vmatpush3.msra.mxu1 %v745_v34 }
  0xfd   : > { %2729 = vmatprep.subr.mxu1 %v3063_v1 }
  0xfe   : > { %v983_v47 = vpop.f32.mrf.mxu0 }
  0xff   : > { %v1137_v51 = vmul.f32 0.35355338, %v983_v47 }
 0x100   : > { %v2728_v48 = vpop.f32.mrf.mxu0 }
 0x106   : > { %v1133_v4 = vpop.f32.mrf.mxu0 }
 0x108   : > { %v2750_v7 = vpop.f32.mrf.mxu0 }
 0x1b2   : > { %v1375_v19 = vpop.f32.mrf.mxu0 }
 0x1b3   : > { %v1529_v23 = vmul.f32 0.35355338, %v1375_v19  ;;  %v2090_v19 = vld [vmem:[%s3656_s6 + $0x8] sm:$0xff] }
 0x1b4   : > { %v2771_v20 = vpop.f32.mrf.mxu0 }
 0x1b5   : > { %v2089_v20 = vld [vmem:[%s3656_s6] sm:$0xff] }
 0x1bb   : > { %v823_v25 = vpop.f32.mrf.mxu1 }
 0x1bc   : > { %v824_v26 = vadd.f32 %v823_v25, %v3292_v24 }
 0x1bd   : > { %v2712_v27 = vpop.f32.mrf.mxu1 }
 0x1be   : > { %v827_v28 = vsel %vm750_vm2, %v824_v26, -inf  ;;  %v2544_v27 = vld [vmem:[%s3655_s5 + $0x58] sm:$0xff] }
 0x1bf   : > { %828 = vmax.xlane.f32.xlu0 %v827_v28  ;;  %v2543_v28 = vld [vmem:[%s3655_s5 + $0x50] sm:$0xff]  ;;  %2784 = vmatpush3.msra.mxu0 %v2544_v27 }
 0x1c0   : > { %2785 = vmatprep.subr.mxu0 %v3063_v1 }
 0x1c1   : > { %2786 = vmatpush3.msra.mxu0 %v2543_v28 }
 0x1c2   : > { %2787 = vmatprep.subr.mxu0 %v3063_v1 }
 0x248   : > { %v829_v29 = vpop.xlane.xlu0 %828 }
 0x249   : > { %v830_v30 = vsub.f32 %v824_v26, %v829_v29  ;;  %v2542_v29 = vld [vmem:[%s3655_s5 + $0x48] sm:$0xff] }
 0x24a   : > { %2788 = vmatpush3.msra.mxu0 %v2542_v29 }
 0x24b   : > { %v831_v31 = vmul.f32 1.442695, %v830_v30  ;;  %v2541_v30 = vld [vmem:[%s3655_s5 + $0x40] sm:$0xff]  ;;  %2789 = vmatprep.subr.mxu0 %v3063_v1 }
 0x24c   : > { %2790 = vmatpush3.msra.mxu0 %v2541_v30 }
 0x24d   : > { %2950 = vpow2.f32 %v831_v31  ;;  %2792 = vmatmul.mubr.msk.f32.vlgmr.msra.gmra.mxu0 %vm524_vm1, %v3258_v10  ;;  %2804 = vmatprep.subr.mxu0 %v3063_v1 }
 0x24e   : > { %2812 = vmatprep.mubr.msk.f32.mxu0 %vm3064_vm0, %v3063_v1 }
 0x25a   : > { %v2951_v32 = vpop.eup %2950 }
 0x25b   : > { %v833_v33 = vsel %vm750_vm2, %v2951_v32, 0.0 }
 0x25c   : > { %834 = vadd.xlane.f32.xlu0 %v833_v33 }
 0x2e5   : > { %v835_v40 = vpop.xlane.xlu0 %834 }
 0x2e6   : > { %2952 = vrcp.f32 %v835_v40 }
 0x2f3   : > { %v2953_v41 = vpop.eup %2952 }
 0x2f4   : > { %v837_v42 = vmul.f32 %v2953_v41, %v2951_v32 }
 0x2f6   : > { %2716 = vmatmul.mubr.msk.f32.vlgmr.msra.gmra.mxu1 %vm750_vm2, %v837_v42  ;;  %v2552_v42 = vld [vmem:[%s3677_s3 + $0x78] sm:$0xff] }
 0x2f7   : > { %2730 = vmatpush3.msra.mxu1 %v2521_v43  ;;  %2737 = vmatprep.mubr.msk.f32.mxu1 %vm3064_vm0, %v3063_v1  ;;  %v2551_v43 = vld [vmem:[%s3677_s3 + $0x70] sm:$0xff] }
 0x2f8   : > { %2731 = vmatprep.subr.mxu1 %v3063_v1  ;;  %2805 = vmatpush3.msra.mxu0 %v2552_v42  ;;  %v2284_v42 = vld [vmem:[%s3661_s11 + $0x18] sm:$0xff] }
 0x2f9   : > { %2732 = vmatpush3.msra.mxu1 %v2520_v44  ;;  %2806 = vmatprep.subr.mxu0 %v3063_v1  ;;  %v2550_v44 = vld [vmem:[%s3677_s3 + $0x68] sm:$0xff] }
 0x2fa   : > { %2733 = vmatprep.subr.mxu1 %v3063_v1  ;;  %2807 = vmatpush3.msra.mxu0 %v2551_v43 }
 0x2fb   : > { %2734 = vmatpush3.msra.mxu1 %v2519_v45  ;;  %2808 = vmatprep.subr.mxu0 %v3063_v1  ;;  %v2549_v45 = vld [vmem:[%s3677_s3 + $0x60] sm:$0xff]  ;;  %s2414_s3 = scalar_lea.hbm %s3665_s15, %s2577_s20 }
 0x2fc   : > { %2735 = vmatprep.subr.mxu1 %v3063_v1  ;;  %2809 = vmatpush3.msra.mxu0 %v2550_v44 }
 0x2fd   : > { %2736 = vmatpush3.msra.mxu1 %v2518_v46  ;;  %2810 = vmatprep.subr.mxu0 %v3063_v1 }
 0x2fe   : > { %2738 = vmatmul.mubr.msk.f32.vlgmr.msra.gmra.mxu1 %vm524_vm1, %v3258_v10  ;;  %2751 = vmatprep.subr.mxu1 %v3063_v1 }
 0x2ff   : > { %2753 = vmatprep.mubr.msk.f32.mxu1 %vm3064_vm0, %v3063_v1  ;;  %2811 = vmatpush3.msra.mxu0 %v2549_v45 }
 0x300   : > { %2813 = vmatmul.mubr.msk.f32.vlgmr.msra.gmra.mxu0 %vm524_vm1, %v3233_v5  ;;  %2826 = vmatprep.subr.mxu0 %v3063_v1 }
 0x301   : > { %2834 = vmatprep.mubr.msk.f32.mxu0 %vm3064_vm0, %v3063_v1 }
 0x30d   : > { %v1525_v40 = vpop.f32.mrf.mxu0 }
 0x30f   : > { %v2793_v41 = vpop.f32.mrf.mxu0 }
 0x310   : > { %v2285_v41 = vld [vmem:[%s3661_s11 + $0x20] sm:$0xff] }
 0x3b6   : > { %v907_v49 = vpop.f32.mrf.mxu1 }
 0x3b7   : > { %911 = vst.msk [vmem:[#allocation2] sm:$0xff] %vm750_vm2, %v907_v49  ;;  %v2557_v49 = vld [vmem:[%s3679_s4 + $0x78] sm:$0xff] }
 0x3b8   : > { %v2717_v50 = vpop.f32.mrf.mxu1 }
 0x3b9   : > { %v2556_v50 = vld [vmem:[%s3679_s4 + $0x70] sm:$0xff] }
 0x3be   : > { %v1058_v52 = vpop.f32.mrf.mxu1 }
 0x3bf   : > { %2752 = vmatpush3.xpose.msk.msra.mxu1 %vm750_vm2, %v1058_v52  ;;  %v2554_v52 = vld [vmem:[%s3679_s4 + $0x60] sm:$0xff] }
 0x3c0   : > { %v2739_v53 = vpop.f32.mrf.mxu1  ;;  %2756 = vmatprep.subr.mxu1 %v3063_v1 }
 0x3c1   : > { %v1767_v53 = vpop.f32.mrf.mxu0 }
 0x3c2   : > { %2754 = vmatmul.mubr.msk.f32.vlgmr.msra.gmra.mxu1 %vm750_vm2, %v1137_v51  ;;  %v2555_v51 = vld [vmem:[%s3679_s4 + $0x68] sm:$0xff]  ;;  %v1921_v57 = vmul.f32 0.35355338, %v1767_v53  ;;  %s2402_s4 = scalar_lea.sflag [#allocation6], %s498_s21 }
 0x3c3   : > { %2758 = vmatprep.mubr.msk.f32.mxu1 %vm3064_vm0, %v3063_v1  ;;  %2757 = vmatpush3.msra.mxu1 %v1133_v4  ;;  %v2814_v54 = vpop.f32.mrf.mxu0  ;;  %v2282_v53 = vld [vmem:[%s3661_s11 + $0x8] sm:$0xff] }
 0x3c4   : > { %2772 = vmatprep.subr.mxu1 %v3063_v1  ;;  %v2281_v54 = vld [vmem:[%s3661_s11] sm:$0xff] }
 0x482   : > { %v1210_v58 = vpop.f32.mrf.mxu1 }
 0x483   : > { %v1211_v59 = vadd.f32 %v1210_v58, %v3292_v24 }
 0x484   : > { %v2755_v60 = vpop.f32.mrf.mxu1 }
 0x485   : > { %v1214_v61 = vsel %vm750_vm2, %v1211_v59, -inf  ;;  %v2562_v60 = vld [vmem:[%s3655_s5 + $0x78] sm:$0xff] }
 0x486   : > { %1215 = vmax.xlane.f32.xlu1 %v1214_v61  ;;  %v2561_v61 = vld [vmem:[%s3655_s5 + $0x70] sm:$0xff]  ;;  %2827 = vmatpush3.msra.mxu0 %v2562_v60  ;;  %v2572_v60 = vld [vmem:[%s3662_s12] ss:$0 sm:$0xff] }
 0x487   : > { %2828 = vmatprep.subr.mxu0 %v3063_v1 }
 0x488   : > { %2829 = vmatpush3.msra.mxu0 %v2561_v61 }
 0x489   : > { %2830 = vmatprep.subr.mxu0 %v3063_v1 }
 0x50f   : > { %v1216_v62 = vpop.xlane.xlu1 %1215 }
 0x510   : > { %v1217_v63 = vsub.f32 %v1211_v59, %v1216_v62  ;;  %v2560_v62 = vld [vmem:[%s3655_s5 + $0x68] sm:$0xff] }
 0x511   : > { %2831 = vmatpush3.msra.mxu0 %v2560_v62 }
 0x512   : > { %v1218_v0 = vmul.f32 1.442695, %v1217_v63  ;;  %v2559_v63 = vld [vmem:[%s3655_s5 + $0x60] sm:$0xff]  ;;  %2832 = vmatprep.subr.mxu0 %v3063_v1 }
 0x513   : > { %2833 = vmatpush3.msra.mxu0 %v2559_v63 }
 0x514   : > { %2954 = vpow2.f32 %v1218_v0  ;;  %2835 = vmatmul.mubr.msk.f32.vlgmr.msra.gmra.mxu0 %vm524_vm1, %v3258_v10  ;;  %2847 = vmatprep.subr.mxu0 %v3063_v1 }
 0x515   : > { %2855 = vmatprep.mubr.msk.f32.mxu0 %vm3064_vm0, %v3063_v1 }
 0x521   : > { %v2955_v2 = vpop.eup %2954 }
 0x522   : > { %v1220_v3 = vsel %vm750_vm2, %v2955_v2, 0.0 }
 0x523   : > { %1221 = vadd.xlane.f32.xlu1 %v1220_v3 }
 0x5ac   : > { %v1222_v12 = vpop.xlane.xlu1 %1221 }
 0x5ad   : > { %2956 = vrcp.f32 %v1222_v12 }
 0x5ba   : > { %v2957_v13 = vpop.eup %2956 }
 0x5bb   : > { %v1224_v14 = vmul.f32 %v2957_v13, %v2955_v2 }
 0x5bd   : > { %2759 = vmatmul.mubr.msk.f32.vlgmr.msra.gmra.mxu1 %vm750_vm2, %v1224_v14 }
 0x5be   : > { %2773 = vmatpush3.msra.mxu1 %v2539_v15  ;;  %2780 = vmatprep.mubr.msk.f32.mxu1 %vm3064_vm0, %v3063_v1 }
 0x5bf   : > { %2774 = vmatprep.subr.mxu1 %v3063_v1 }
 0x5c0   : > { %2775 = vmatpush3.msra.mxu1 %v2538_v16 }
 0x5c1   : > { %2776 = vmatprep.subr.mxu1 %v3063_v1 }
 0x5c2   : > { %2777 = vmatpush3.msra.mxu1 %v2537_v17  ;;  %v2092_v17 = vld [vmem:[%s3656_s6 + $0x18] sm:$0xff] }
 0x5c3   : > { %2778 = vmatprep.subr.mxu1 %v3063_v1  ;;  %2848 = vmatpush3.msra.mxu0 %v2092_v17 }
 0x5c4   : > { %2779 = vmatpush3.msra.mxu1 %v2536_v18  ;;  %v2091_v18 = vld [vmem:[%s3656_s6 + $0x10] sm:$0xff]  ;;  %2849 = vmatprep.subr.mxu0 %v3063_v1 }
 0x5c5   : > { %2781 = vmatmul.mubr.msk.f32.vlgmr.msra.gmra.mxu1 %vm524_vm1, %v3258_v10  ;;  %2794 = vmatprep.subr.mxu1 %v3063_v1 }
 0x5c6   : > { %2796 = vmatprep.mubr.msk.f32.mxu1 %vm3064_vm0, %v3063_v1  ;;  %2850 = vmatpush3.msra.mxu0 %v2091_v18 }
 0x5c7   : > { %2851 = vmatprep.subr.mxu0 %v3063_v1 }
 0x5c8   : > { %2852 = vmatpush3.msra.mxu0 %v2090_v19 }
 0x5c9   : > { %2853 = vmatprep.subr.mxu0 %v3063_v1 }
 0x5ca   : > { %2854 = vmatpush3.msra.mxu0 %v2089_v20 }
 0x5cb   : > { %2869 = vmatprep.subr.mxu0 %v3063_v1 }
 0x5d4   : > { %v1917_v12 = vpop.f32.mrf.mxu0 }
 0x67d   : > { %v3414_v21 = vpop.f32.mrf.mxu1 }
 0x67f   : > { %v2760_v22 = vpop.f32.mrf.mxu1 }
 0x685   : > { %v1450_v25 = vpop.f32.mrf.mxu1 }
 0x686   : > { %2795 = vmatpush3.xpose.msk.msra.mxu1 %vm750_vm2, %v1450_v25 }
 0x687   : > { %v2782_v26 = vpop.f32.mrf.mxu1  ;;  %2799 = vmatprep.subr.mxu1 %v3063_v1 }
 0x689   : > { %2797 = vmatmul.mubr.msk.f32.vlgmr.msra.gmra.mxu1 %vm750_vm2, %v1529_v23 }
 0x68a   : > { %2801 = vmatprep.mubr.msk.f32.mxu1 %vm3064_vm0, %v3063_v1  ;;  %2800 = vmatpush3.msra.mxu1 %v1525_v40  ;;  %v2286_v40 = vld [vmem:[%s3661_s11 + $0x28] sm:$0xff] }
 0x68b   : > { %2815 = vmatprep.subr.mxu1 %v3063_v1 }
 0x749   : > { %v1602_v31 = vpop.f32.mrf.mxu1 }
 0x74a   : > { %v1603_v32 = vadd.f32 %v1602_v31, %v3292_v24 }
 0x74b   : > { %v2798_v33 = vpop.f32.mrf.mxu1 }
 0x74c   : > { %v1606_v34 = vsel %vm750_vm2, %v1603_v32, -inf }
 0x74d   : > { %1607 = vmax.xlane.f32.xlu0 %v1606_v34 }
 0x7d6   : > { %v1608_v35 = vpop.xlane.xlu0 %1607 }
 0x7d7   : > { %v1609_v36 = vsub.f32 %v1603_v32, %v1608_v35  ;;  %v2199_v35 = vld [vmem:[%s3659_s9 + $0x18] sm:$0xff] }
 0x7d9   : > { %v1610_v37 = vmul.f32 1.442695, %v1609_v36  ;;  %v2197_v36 = vld [vmem:[%s3659_s9 + $0x8] sm:$0xff] }
 0x7db   : > { %2958 = vpow2.f32 %v1610_v37  ;;  %v2196_v37 = vld [vmem:[%s3659_s9] sm:$0xff] }
 0x7e8   : > { %v2959_v38 = vpop.eup %2958 }
 0x7e9   : > { %v1612_v39 = vsel %vm750_vm2, %v2959_v38, 0.0 }
 0x7ea   : > { %1613 = vadd.xlane.f32.xlu1 %v1612_v39  ;;  %v2287_v39 = vld [vmem:[%s3661_s11 + $0x30] sm:$0xff] }
 0x873   : > { %v1614_v46 = vpop.xlane.xlu1 %1613 }
 0x874   : > { %2960 = vrcp.f32 %v1614_v46 }
 0x881   : > { %v2961_v47 = vpop.eup %2960 }
 0x882   : > { %v1616_v48 = vmul.f32 %v2961_v47, %v2959_v38  ;;  %v2288_v38 = vld [vmem:[%s3661_s11 + $0x38] sm:$0xff]  ;;  %v2568_v47 = vld [vmem:[%s3657_s7] ss:$0 sm:$0xff] }
 0x884   : > { %2802 = vmatmul.mubr.msk.f32.vlgmr.msra.gmra.mxu1 %vm750_vm2, %v1616_v48 }
 0x885   : > { %2816 = vmatpush3.msra.mxu1 %v2557_v49  ;;  %2823 = vmatprep.mubr.msk.f32.mxu1 %vm3064_vm0, %v3063_v1  ;;  %v2569_v49 = vld [vmem:[%s3658_s8] ss:$0 sm:$0xff] }
 0x886   : > { %2817 = vmatprep.subr.mxu1 %v3063_v1 }
 0x887   : > { %2818 = vmatpush3.msra.mxu1 %v2556_v50 }
 0x888   : > { %2819 = vmatprep.subr.mxu1 %v3063_v1 }
 0x889   : > { %2820 = vmatpush3.msra.mxu1 %v2555_v51 }
 0x88a   : > { %2821 = vmatprep.subr.mxu1 %v3063_v1 }
 0x88b   : > { %2822 = vmatpush3.msra.mxu1 %v2554_v52  ;;  %v2283_v52 = vld [vmem:[%s3661_s11 + $0x10] sm:$0xff] }
 0x88c   : > { %2824 = vmatmul.mubr.msk.f32.vlgmr.msra.gmra.mxu1 %vm524_vm1, %v3258_v10  ;;  %2837 = vmatprep.subr.mxu1 %v3063_v1 }
 0x88d   : > { %2839 = vmatprep.mubr.msk.f32.mxu1 %vm3064_vm0, %v3063_v1 }
 0x944   : > { %v1686_v55 = vpop.f32.mrf.mxu1 }
 0x946   : > { %v2803_v56 = vpop.f32.mrf.mxu1 }
 0x94c   : > { %v1842_v58 = vpop.f32.mrf.mxu1 }
 0x94d   : > { %2838 = vmatpush3.xpose.msk.msra.mxu1 %vm750_vm2, %v1842_v58 }
 0x94e   : > { %v2825_v59 = vpop.f32.mrf.mxu1  ;;  %2842 = vmatprep.subr.mxu1 %v3063_v1 }
 0x950   : > { %2840 = vmatmul.mubr.msk.f32.vlgmr.msra.gmra.mxu1 %vm750_vm2, %v1921_v57 }
 0x951   : > { %2844 = vmatprep.mubr.msk.f32.mxu1 %vm3064_vm0, %v3063_v1  ;;  %2843 = vmatpush3.msra.mxu1 %v1917_v12  ;;  %v2574_v12 = vld [vmem:[%s3663_s13] ss:$0 sm:$0xff] }
 0x952   : > { %2858 = vmatprep.subr.mxu1 %v3063_v1 }
 0xa10   : > { %v1994_v0 = vpop.f32.mrf.mxu1 }
 0xa11   : > { %v1995_v2 = vadd.f32 %v1994_v0, %v3292_v24  ;;  %v2836_v24 = vpop.f32.mrf.mxu0 }
 0xa12   : > { %v2841_v3 = vpop.f32.mrf.mxu1 }
 0xa13   : > { %v1998_v4 = vsel %vm750_vm2, %v1995_v2, -inf }
 0xa14   : > { %1999 = vmax.xlane.f32.xlu0 %v1998_v4 }
 0xa2a   : > { %1299 = vrot.lane.b32.xlu0 %v3414_v21, %s3066_s22  ;;  %s2982_s22 = scalar_lea.vmem %s2417_s18, 128 }
 0xa2b   : > { %p2983_p3 = scmp.ne.s32.totalorder %s2417_s18, %s2982_s22 }
 0xa2d   : > { %p2984_p4 = pnand %p2983_p3, %p3193_p9 }
 0xa2f   : > { %p2985_p5 = pneg %p2984_p4 }
 0xa9d   : > { %v2000_v6 = vpop.xlane.xlu0 %1999 }
 0xa9e   : > { %v2001_v7 = vsub.f32 %v1995_v2, %v2000_v6 }
 0xaa0   : > { %v2002_v8 = vmul.f32 1.442695, %v2001_v7 }
 0xaa1   : > { %v1300_v10 = vpop.permute.xlu0 %1299 }
 0xaa2   : > { %2962 = vpow2.f32 %v2002_v8  ;;  %1303 = vst.msk [vmem:[#allocation2] sm:$0xff] %vm1302_vm4, %v1300_v10 }
 0xaaf   : > { %v2963_v9 = vpop.eup %2962 }
 0xab0   : > { %v2004_v11 = vsel %vm750_vm2, %v2963_v9, 0.0 }
 0xab1   : > { %2005 = vadd.xlane.f32.xlu1 %v2004_v11 }
 0xac2   : > { %1691 = vrot.lane.b32.xlu1 %v1686_v55, %s3067_s28  ;;  %s3068_s28 = smov 24   ;;  %v2570_v55 = vld [vmem:[%s3660_s10] ss:$0 sm:$0xff] }
 0xb3a   : > { %v2006_v13 = vpop.xlane.xlu1 %2005 }
 0xb3b   : > { %2964 = vrcp.f32 %v2006_v13  ;;  %v2575_v13 = vld [vmem:[%s3664_s14] ss:$0 sm:$0xff] }
 0xb3e   : > { %v1692_v14 = vpop.permute.xlu1 %1691 }
 0xb3f   : > { %1695 = vst.msk [vmem:[#allocation2] sm:$0xff] %vm1694_vm5, %v1692_v14 }
 0xb48   : > { %v2965_v15 = vpop.eup %2964 }
 0xb49   : > { %v2008_v16 = vmul.f32 %v2965_v15, %v2963_v9 }
 0xb4b   : > { %2845 = vmatmul.mubr.msk.f32.vlgmr.msra.gmra.mxu1 %vm750_vm2, %v2008_v16 }
 0xb4c   : > { %2866 = vmatprep.mubr.msk.f32.mxu1 %vm3064_vm0, %v3063_v1  ;;  %2859 = vmatpush3.msra.mxu1 %v2199_v35 }
 0xb4d   : > { %2860 = vmatprep.subr.mxu1 %v3063_v1 }
 0xc0b   : > { %v2078_v21 = vpop.f32.mrf.mxu1 }
 0xc0c   : > { %2083 = vrot.lane.b32.xlu1 %v2078_v21, %s3068_s28  ;;  %s3069_s28 = smov [#allocation5]  }
 0xc0d   : > { %v2846_v22 = vpop.f32.mrf.mxu1  ;;  %s2986_s26 = sshll.u32 %s3069_s28, 4  ;;  %s2987_s26 = int_to_ptr.vmem [resolvable:$false] %s2986_s26 }
 0xc0e   : > { %s2988_s25 = scalar_lea.vmem %s2987_s26, 256  ;;  %p2989_p6 = scmp.lt.s32.totalorder %s2417_s18, %s2987_s26 }
 0xc0f   : > { %p2990_p7 = scmp.lt.s32.totalorder %s2988_s25, %s2982_s22 }
 0xc11   : > { %p2991_p8 = por %p2990_p7, %p2989_p6 }
 0xc13   : > { %p2992_p10 = pnand %p2991_p8, %p2985_p5 }
 0xc7e   : > { %v2084_v23 = vpop.permute.xlu1 %2083 }
 0xc7f   : > { %2087 = vst.msk [vmem:[#allocation2] sm:$0xff] %vm2086_vm6, %v2084_v23 }
 0xc86   : > { %v2088_v25 = vld [vmem:[#allocation2] sm:$0xff] }
 0xc87   : > { %2856 = vmatmul.mubr.msk.f32.vlgmr.msra.gmra.mxu0 %vm524_vm1, %v2088_v25 }
 0xc88   : > { %2885 = vmatprep.mubr.msk.f32.mxu0 %vm3064_vm0, %v3063_v1  ;;  %2870 = vmatpush3.msra.mxu0 %v2288_v38 }
 0xc89   : > { %2871 = vmatprep.subr.mxu0 %v3063_v1 }
 0xc8a   : > { %2872 = vmatpush3.msra.mxu0 %v2287_v39 }
 0xc8b   : > { %2873 = vmatprep.subr.mxu0 %v3063_v1 }
 0xc8c   : > { %2874 = vmatpush3.msra.mxu0 %v2286_v40 }
 0xc8d   : > { %2875 = vmatprep.subr.mxu0 %v3063_v1 }
 0xc8e   : > { %2876 = vmatpush3.msra.mxu0 %v2285_v41 }
 0xc8f   : > { %2877 = vmatprep.subr.mxu0 %v3063_v1 }
 0xc90   : > { %2878 = vmatpush3.msra.mxu0 %v2284_v42 }
 0xc91   : > { %2879 = vmatprep.subr.mxu0 %v3063_v1 }
 0xc92   : > { %2880 = vmatpush3.msra.mxu0 %v2283_v52 }
 0xc93   : > { %2881 = vmatprep.subr.mxu0 %v3063_v1 }
 0xc94   : > { %2882 = vmatpush3.msra.mxu0 %v2282_v53 }
 0xc95   : > { %2883 = vmatprep.subr.mxu0 %v3063_v1 }
 0xc96   : > { %2884 = vmatpush3.msra.mxu0 %v2281_v54 }
 0xd47   : > { %v2162_v26 = vpop.f32.mrf.mxu0 }
 0xd48   : > { %v2163_v27 = vadd.f32 %v2162_v26, %v3233_v5  ;;  %v2198_v5 = vld [vmem:[%s3659_s9 + $0x10] sm:$0xff] }
 0xd49   : > { %v2857_v28 = vpop.f32.mrf.mxu0  ;;  %2861 = vmatpush3.msra.mxu1 %v2198_v5 }
 0xd4a   : > { %v2168_v29 = vsel %vm524_vm1, %v2163_v27, 0.0  ;;  %2862 = vmatprep.subr.mxu1 %v3063_v1 }
 0xd4b   : > { %2169 = vadd.xlane.f32.xlu1 %v2168_v29  ;;  %2863 = vmatpush3.msra.mxu1 %v2197_v36 }
 0xd4c   : > { %2864 = vmatprep.subr.mxu1 %v3063_v1 }
 0xd4d   : > { %2865 = vmatpush3.msra.mxu1 %v2196_v37 }
 0xdd4   : > { %v2170_v30 = vpop.xlane.xlu1 %2169 }
 0xdd5   : > { %v2172_v31 = vmul.f32 0.03125, %v2170_v30 }
 0xdd7   : > { %v2173_v32 = vsub.f32 %v2163_v27, %v2172_v31 }
 0xdd9   : > { %v2174_v33 = vmul.f32 %v2173_v32, %v2173_v32 }
 0xddb   : > { %v2175_v34 = vsel %vm524_vm1, %v2174_v33, 0.0 }
 0xddc   : > { %2176 = vadd.xlane.f32.xlu0 %v2175_v34 }
 0xe65   : > { %v2177_v43 = vpop.xlane.xlu0 %2176 }
 0xe66   : > { %v2178_v44 = vmul.f32 0.03125, %v2177_v43 }
 0xe68   : > { %v2179_v45 = vadd.f32 1e-05, %v2178_v44 }
 0xe6a   : > { %2966 = vrsqrt.f32 %v2179_v45 }
 0xe77   : > { %v2967_v46 = vpop.eup %2966 }
 0xe78   : > { %v2181_v48 = vmul.f32 %v2967_v46, %v2173_v32 }
 0xe7a   : > { %v2188_v50 = vmul.f32 %v2568_v47, %v2181_v48 }
 0xe7c   : > { %v2195_v51 = vadd.f32 %v2569_v49, %v2188_v50 }
 0xe7e   : > { %2867 = vmatmul.mubr.msk.f32.vlgmr.msra.gmra.mxu1 %vm524_vm1, %v2195_v51 }
 0xf3e   : > { %v2276_v56 = vpop.f32.mrf.mxu1 }
 0xf3f   : > { %v2277_v57 = vadd.f32 %v2570_v55, %v2276_v56 }
 0xf40   : > { %v2868_v58 = vpop.f32.mrf.mxu1 }
 0xf41   : > { %v2280_v59 = vmax.f32 %v2277_v57, 0.0 }
 0xf43   : > { %2886 = vmatmul.mubr.msk.f32.vlgmr.msra.gmra.mxu0 %vm2296_vm7, %v2280_v59 }
0x1003   : > { %v2366_v1 = vpop.f32.mrf.mxu0 }
0x1004   : > { %v2367_v61 = vadd.f32 %v2572_v60, %v2366_v1 }
0x1005   : > { %v2887_v62 = vpop.f32.mrf.mxu0 }
0x1006   : > { %v2370_v63 = vadd.f32 %v2367_v61, %v2195_v51 }
0x1008   : > { %v2373_v0 = vsel %vm524_vm1, %v2370_v63, 0.0 }
0x1009   : > { %2374 = vadd.xlane.f32.xlu0 %v2373_v0 }
0x1092   : > { %v2375_v2 = vpop.xlane.xlu0 %2374 }
0x1093   : > { %v2376_v3 = vmul.f32 0.03125, %v2375_v2 }
0x1095   : > { %v2377_v4 = vsub.f32 %v2370_v63, %v2376_v3 }
0x1097   : > { %v2378_v6 = vmul.f32 %v2377_v4, %v2377_v4 }
0x1099   : > { %v2379_v7 = vsel %vm524_vm1, %v2378_v6, 0.0 }
0x109a   : > { %2380 = vadd.xlane.f32.xlu0 %v2379_v7 }
0x1123   : > { %v2381_v8 = vpop.xlane.xlu0 %2380 }
0x1124   : > { %v2382_v10 = vmul.f32 0.03125, %v2381_v8 }
0x1126   : > { %v2383_v9 = vadd.f32 1e-05, %v2382_v10 }
0x1128   : > { %2968 = vrsqrt.f32 %v2383_v9 }
0x1135   : > { %v2969_v11 = vpop.eup %2968 }
0x1136   : > { %v2385_v24 = vmul.f32 %v2969_v11, %v2377_v4 }
0x1138   : > { %v2392_v14 = vmul.f32 %v2574_v12, %v2385_v24 }
0x113a   : > { %v2399_v15 = vadd.f32 %v2575_v13, %v2392_v14 }
0x113c   : > { %2400 = vst.msk [vmem:[%s500_s29] sm:$0xff] %vm524_vm1, %v2399_v15 }
0x113d   : > { %2995 = shalt.err (!%p2992_p10)
}
0x113e   : > { %s2996_s1 = scalar_lea.hbm %s2414_s3, 128  ;;  %s3000_s16 = scalar_lea.hbm %s3665_s15, 256 }
0x113f   : > { %p2997_p11 = scmp.ne.s32.totalorder %s2414_s3, %s2996_s1  ;;  %p3001_p1 = scmp.lt.s32.totalorder %s2414_s3, %s3665_s15 }
0x1140   : > { %p3002_p2 = scmp.lt.s32.totalorder %s3000_s16, %s2996_s1 }
0x1141   : > { %p2998_p12 = pnand %p2997_p11, %p3193_p9 }
0x1142   : > { %p3003_p3 = por %p3002_p2, %p3001_p1 }
0x1143   : > { %p2999_p0 = pneg %p2998_p12 }
0x1145   : > { %p3004_p4 = pnand %p3003_p3, %p2999_p0 }
0x1147   : > { %3007 = shalt.err (!%p3004_p4)
}
0x1148   : > { %2888 = dma.vmem_to_hbm [thread:$0]  (%p3193_p9), %s2417_s18, 128, %s2414_s3, %s2402_s4  }
0x1149 PF: > { %p2894_p5 = scmp.ge.s32.totalorder %s3060_s27, 2  ;;  %s2428_s29 = sand.u32 1, %s3040_s23  }
0x114a   : > { %s2429_s22 = scalar_lea.sflag [#allocation6], %s2428_s29 }
0x114b   : > { %p2891_p6 = pnand %p2894_p5, %p3200_p13 }
0x114d   : > { %p2892_p7 = pneg %p2891_p6 }
0x114f   : > { %3035 = dma.done.wait (%p2892_p7), %s2429_s22, 128  }
0x1150   : > { %3037 = vsyncadd (%p2892_p7), %s2429_s22, 4294967168  ;;  %s34_s27 = sadd.s32 1, %s3060_s27   ;;  %s3681_s28 = sld [smem:[#allocation11_spill]] }
0x1151   : > { %p31_p8 = scmp.ge.s32.totalorder %s34_s27, 4   ;;  %s3682_s25 = sld [smem:[#allocation9_spill]] }
0x1152   : > { %s3683_s26 = sld [smem:[#allocation10_spill]]  ;;  %s3684_s23 = smov %s3044_s24 }
0x1153   : > { %s3685_s24 = smov %s3048_s0  ;;  %33 = sbr.rel (!%p31_p8) target bundleno = 21 (0x15), region = 123 }
0x1156   : > { %s3686_s0 = smov %s3681_s28 }
0x1158   :  { %2434 = vsyncpa [#allocation6], 1 }
0x1159   :  { %2436 = vsyncpa [#allocation6 + $0x1], 1 }

</bundles_post_ra>
